<compile_context>
chip_gen: v7x
topology: tpu7x:2x2x1
jax: 0.10.0
libtpu: 0.0.40
codegen_flags: <defaults>
</compile_context>

<pallas_src>
import jax
import jax.numpy as jnp
from jax.experimental import pallas as pl
from jax.experimental.pallas import tpu as pltpu  # noqa: F401

# ----------------------------- config (small, DistilBERT-like) ---------------
B, S = 2, 8          # batch, sequence length
D = 32               # hidden dim        (distilbert: 768)
NH = 4               # attention heads   (distilbert: 12)
HD = D // NH         # per-head dim
FF = 4 * D           # FFN hidden dim    (distilbert: 3072)
NLAYERS = 2          # transformer layers (distilbert: 6)
VOCAB = 50
MAXPOS = 16
OUT = 16             # AnsEncoder output_size
OUT_PAD = 128        # lane-dense padded output width
EPS = 1e-12          # DistilBERT LayerNorm eps


# ----------------------------- in-kernel helpers ------------------------------
def _layer_norm(x, gamma, beta):
    mu = jnp.mean(x, axis=-1, keepdims=True)
    var = jnp.mean((x - mu) ** 2, axis=-1, keepdims=True)
    return (x - mu) * jax.lax.rsqrt(var + EPS) * gamma + beta


def _gelu(x):
    # TODO(synk): HF DistilBERT uses exact erf-GELU; tanh approximation used here.
    c = jnp.float32(0.7978845608028654)  # sqrt(2/pi)
    return 0.5 * x * (1.0 + jnp.tanh(c * (x + 0.044715 * x * x * x)))


# ----------------------------- fused forward kernel ---------------------------
def fused_encoder_kernel(emb_ref, mask_ref, eg_ref, eb_ref,
                         wqkv_ref, bqkv_ref, wo_ref, bo_ref,
                         g1_ref, be1_ref, w1_ref, bf1_ref,
                         w2_ref, bf2_ref, g2_ref, be2_ref,
                         wp_ref, bp_ref, wout_ref, bout_ref,
                         o_ref):
    # ---- embedding LayerNorm (f32) -------------------------------------------
    emb = emb_ref[...].astype(jnp.float32)                       # [B, S, D]
    x = _layer_norm(emb, eg_ref[...], eb_ref[...])
    xf = x.reshape(B * S, D)                                     # flat activations (f32)

    # additive key mask: 0 where valid, -1e9 at pads, shape [B, 1, S] (kept in f32)
    neg = ((mask_ref[...].astype(jnp.float32) - 1.0) * 1e9).reshape(B, 1, S)

    scale = jnp.float32(1.0 / (HD ** 0.5))

    for l in range(NLAYERS):                                     # static layer loop
        wqkv = wqkv_ref[l]                                       # [D, 3D]  bf16
        wo_l = wo_ref[l]                                         # [D, D]   bf16

        # fused QKV projection on the flattened batch*seq slab
        qkv = jnp.dot(xf.astype(jnp.bfloat16), wqkv,
                      preferred_element_type=jnp.float32) + bqkv_ref[l]   # [B*S, 3D] f32
        q3 = (qkv[:, 0 * D:1 * D] * scale).reshape(B, S, D)      # scale folded into q
        k3 = qkv[:, 1 * D:2 * D].reshape(B, S, D)
        v3 = qkv[:, 2 * D:3 * D].reshape(B, S, D)

        attn = jnp.zeros((B * S, D), jnp.float32)
        for h in range(NH):                                      # static head loop
            sl = slice(h * HD, (h + 1) * HD)
            qh = q3[:, :, sl].astype(jnp.bfloat16)               # [B, S, HD]
            kh = k3[:, :, sl].astype(jnp.bfloat16)
            vh = v3[:, :, sl].astype(jnp.bfloat16)

            s = jnp.einsum('bqd,bkd->bqk', qh, kh,
                           preferred_element_type=jnp.float32)   # [B, S, S] f32
            s = s + neg
            s = s - jnp.max(s, axis=-1, keepdims=True)
            p = jnp.exp(s)
            p = p * pl.reciprocal(jnp.sum(p, axis=-1, keepdims=True), approx=True)

            ctx = jnp.einsum('bqk,bkd->bqd', p.astype(jnp.bfloat16), vh,
                             preferred_element_type=jnp.float32)  # [B, S, HD]
            # concat + output projection folded together: attn += ctx_h @ Wo[head rows]
            attn = attn + jnp.dot(ctx.reshape(B * S, HD).astype(jnp.bfloat16),
                                  wo_l[sl, :],
                                  preferred_element_type=jnp.float32)
        attn = attn + bo_ref[l]

        h1 = _layer_norm(xf + attn, g1_ref[l], be1_ref[l])       # sa_layer_norm (f32)

        ff = _gelu(jnp.dot(h1.astype(jnp.bfloat16), w1_ref[l],
                           preferred_element_type=jnp.float32) + bf1_ref[l])
        ff = jnp.dot(ff.astype(jnp.bfloat16), w2_ref[l],
                     preferred_element_type=jnp.float32) + bf2_ref[l]
        xf = _layer_norm(h1 + ff, g2_ref[l], be2_ref[l])         # output_layer_norm

    # ---- pooler on the [CLS] token + final Linear (lane-dense padded output) --
    cls = xf.reshape(B, S, D)[:, 0, :]                           # [B, D]
    pooled = jnp.tanh(jnp.dot(cls.astype(jnp.bfloat16), wp_ref[...],
                              preferred_element_type=jnp.float32) + bp_ref[...])
    out = jnp.dot(pooled.astype(jnp.bfloat16), wout_ref[...],
                  preferred_element_type=jnp.float32) + bout_ref[...]    # [B, OUT_PAD]
    o_ref[...] = out.astype(o_ref.dtype)


# ----------------------------- parameter init ---------------------------------
def init_params(key):
    ks = iter(jax.random.split(key, 16))

    def rnd(shape, scale=0.02):
        return scale * jax.random.normal(next(ks), shape, dtype=jnp.float32)

    def stack_bf16(shape):
        return rnd((NLAYERS,) + shape).astype(jnp.bfloat16)

    wout = jnp.zeros((D, OUT_PAD), jnp.float32).at[:, :OUT].set(rnd((D, OUT)))

    params = {
        # embeddings (gather + add done in glue; LayerNorm fused into the kernel)
        "word_emb": rnd((VOCAB, D)),
        "pos_emb": rnd((MAXPOS, D)),
        "emb_ln_g": jnp.ones((1, D), jnp.float32),
        "emb_ln_b": jnp.zeros((1, D), jnp.float32),
        # stacked per-layer transformer weights (bf16 MXU operands, f32 biases/LN)
        "wqkv": stack_bf16((D, 3 * D)),
        "bqkv": jnp.zeros((NLAYERS, 1, 3 * D), jnp.float32),
        "wo": stack_bf16((D, D)),
        "bo": jnp.zeros((NLAYERS, 1, D), jnp.float32),
        "g1": jnp.ones((NLAYERS, 1, D), jnp.float32),
        "be1": jnp.zeros((NLAYERS, 1, D), jnp.float32),
        "w1": stack_bf16((D, FF)),
        "bf1": jnp.zeros((NLAYERS, 1, FF), jnp.float32),
        "w2": stack_bf16((FF, D)),
        "bf2": jnp.zeros((NLAYERS, 1, D), jnp.float32),
        "g2": jnp.ones((NLAYERS, 1, D), jnp.float32),
        "be2": jnp.zeros((NLAYERS, 1, D), jnp.float32),
        # Pooler: tanh(Linear(D, D)), then Linear(D, OUT) padded to 128 lanes
        "wp": rnd((D, D)).astype(jnp.bfloat16),
        "bp": jnp.zeros((1, D), jnp.float32),
        "wout": wout.astype(jnp.bfloat16),
        "bout": jnp.zeros((1, OUT_PAD), jnp.float32),
    }
    return params


# ----------------------------- AnsEncoder.forward ------------------------------
@jax.jit
def ans_encoder_forward(input_ids, attention_mask, params):
    # DistilBERT embedding gather (plain JAX glue — not the hot path)
    emb = params["word_emb"][input_ids] + params["pos_emb"][None, :S, :]   # [B, S, D]
    mask = attention_mask.astype(jnp.float32)                              # [B, S]

    # feat = self.lm(**encoding)[0]; return self.pooler(feat)  — all fused below
    out_pad = pl.pallas_call(
        fused_encoder_kernel,
        out_shape=jax.ShapeDtypeStruct((B, OUT_PAD), jnp.float32),
    )(emb.astype(jnp.float32), mask,
      params["emb_ln_g"], params["emb_ln_b"],
      params["wqkv"], params["bqkv"], params["wo"], params["bo"],
      params["g1"], params["be1"], params["w1"], params["bf1"],
      params["w2"], params["bf2"], params["g2"], params["be2"],
      params["wp"], params["bp"], params["wout"], params["bout"])
    return out_pad[:, :OUT]                                                # [B, OUT]


# ----------------------------- main --------------------------------------------
if __name__ == "__main__":
    key = jax.random.PRNGKey(0)
    k_ids, k_par = jax.random.split(key)

    params = init_params(k_par)

    input_ids = jax.random.randint(k_ids, (B, S), 0, VOCAB, dtype=jnp.int32)
    attention_mask = jnp.array(
        [[1, 1, 1, 1, 1, 1, 1, 1],
         [1, 1, 1, 1, 1, 1, 0, 0]], dtype=jnp.int32)          # batch 1 has 2 pads

    out = ans_encoder_forward(input_ids, attention_mask, params)
    out = jax.block_until_ready(out)

    assert out.shape == (B, OUT) and out.dtype == jnp.float32
    assert bool(jnp.all(jnp.isfinite(out)))
    print("KERNEL_OK")
</pallas_src>

<mosaic_0001>
module attributes {stable_mosaic.version = 11 : i64} {
  func.func @fused_encoder_kernel(%arg0: memref<2x8x32xf32, #tpu.memory_space<vmem>>, %arg1: memref<2x8xf32, #tpu.memory_space<vmem>>, %arg2: memref<1x32xf32, #tpu.memory_space<vmem>>, %arg3: memref<1x32xf32, #tpu.memory_space<vmem>>, %arg4: memref<2x32x96xbf16, #tpu.memory_space<vmem>>, %arg5: memref<2x1x96xf32, #tpu.memory_space<vmem>>, %arg6: memref<2x32x32xbf16, #tpu.memory_space<vmem>>, %arg7: memref<2x1x32xf32, #tpu.memory_space<vmem>>, %arg8: memref<2x1x32xf32, #tpu.memory_space<vmem>>, %arg9: memref<2x1x32xf32, #tpu.memory_space<vmem>>, %arg10: memref<2x32x128xbf16, #tpu.memory_space<vmem>>, %arg11: memref<2x1x128xf32, #tpu.memory_space<vmem>>, %arg12: memref<2x128x32xbf16, #tpu.memory_space<vmem>>, %arg13: memref<2x1x32xf32, #tpu.memory_space<vmem>>, %arg14: memref<2x1x32xf32, #tpu.memory_space<vmem>>, %arg15: memref<2x1x32xf32, #tpu.memory_space<vmem>>, %arg16: memref<32x32xbf16, #tpu.memory_space<vmem>>, %arg17: memref<1x32xf32, #tpu.memory_space<vmem>>, %arg18: memref<32x128xbf16, #tpu.memory_space<vmem>>, %arg19: memref<1x128xf32, #tpu.memory_space<vmem>>, %arg20: memref<2x128xf32, #tpu.memory_space<vmem>>) attributes {dimension_semantics = [], scalar_prefetch = 0 : i64, scratch_operands = 0 : i64, tpu.core_type = #tpu.core_type<tc>} {
    %c0 = arith.constant 0 : index
    %c0_0 = arith.constant 0 : index
    %c0_1 = arith.constant 0 : index
    %0 = vector.load %arg0[%c0, %c0_0, %c0_1] : memref<2x8x32xf32, #tpu.memory_space<vmem>>, vector<2x8x32xf32>
    %c0_2 = arith.constant 0 : index
    %c0_3 = arith.constant 0 : index
    %1 = vector.load %arg2[%c0_2, %c0_3] : memref<1x32xf32, #tpu.memory_space<vmem>>, vector<1x32xf32>
    %c0_4 = arith.constant 0 : index
    %c0_5 = arith.constant 0 : index
    %2 = vector.load %arg3[%c0_4, %c0_5] : memref<1x32xf32, #tpu.memory_space<vmem>>, vector<1x32xf32>
    %cst = arith.constant dense<0.000000e+00> : vector<2x8xf32>
    %3 = vector.multi_reduction <add>, %0, %cst [2] : vector<2x8x32xf32> to vector<2x8xf32>
    %4 = vector.shape_cast %3 : vector<2x8xf32> to vector<2x8x1xf32>
    %cst_6 = arith.constant 3.200000e+01 : f32
    %5 = vector.broadcast %cst_6 : f32 to vector<2x8x1xf32>
    %6 = arith.divf %4, %5 : vector<2x8x1xf32>
    %7 = vector.broadcast %6 : vector<2x8x1xf32> to vector<2x8x32xf32>
    %8 = arith.subf %0, %7 : vector<2x8x32xf32>
    %9 = arith.mulf %8, %8 : vector<2x8x32xf32>
    %cst_7 = arith.constant dense<0.000000e+00> : vector<2x8xf32>
    %10 = vector.multi_reduction <add>, %9, %cst_7 [2] : vector<2x8x32xf32> to vector<2x8xf32>
    %11 = vector.shape_cast %10 : vector<2x8xf32> to vector<2x8x1xf32>
    %cst_8 = arith.constant 3.200000e+01 : f32
    %12 = vector.broadcast %cst_8 : f32 to vector<2x8x1xf32>
    %13 = arith.divf %11, %12 : vector<2x8x1xf32>
    %14 = vector.broadcast %6 : vector<2x8x1xf32> to vector<2x8x32xf32>
    %15 = arith.subf %0, %14 : vector<2x8x32xf32>
    %cst_9 = arith.constant 9.99999996E-13 : f32
    %16 = vector.broadcast %cst_9 : f32 to vector<2x8x1xf32>
    %17 = arith.addf %13, %16 : vector<2x8x1xf32>
    %18 = math.rsqrt %17 : vector<2x8x1xf32>
    %19 = vector.broadcast %18 : vector<2x8x1xf32> to vector<2x8x32xf32>
    %20 = arith.mulf %15, %19 : vector<2x8x32xf32>
    %21 = vector.shape_cast %1 : vector<1x32xf32> to vector<1x1x32xf32>
    %22 = vector.broadcast %21 : vector<1x1x32xf32> to vector<2x8x32xf32>
    %23 = arith.mulf %20, %22 : vector<2x8x32xf32>
    %24 = vector.shape_cast %2 : vector<1x32xf32> to vector<1x1x32xf32>
    %25 = vector.broadcast %24 : vector<1x1x32xf32> to vector<2x8x32xf32>
    %26 = arith.addf %23, %25 : vector<2x8x32xf32>
    %27 = vector.shape_cast %26 : vector<2x8x32xf32> to vector<16x32xf32>
    %c0_10 = arith.constant 0 : index
    %c0_11 = arith.constant 0 : index
    %28 = vector.load %arg1[%c0_10, %c0_11] : memref<2x8xf32, #tpu.memory_space<vmem>>, vector<2x8xf32>
    %cst_12 = arith.constant 1.000000e+00 : f32
    %29 = vector.broadcast %cst_12 : f32 to vector<2x8xf32>
    %30 = arith.subf %28, %29 : vector<2x8xf32>
    %cst_13 = arith.constant 1.000000e+09 : f32
    %31 = vector.broadcast %cst_13 : f32 to vector<2x8xf32>
    %32 = arith.mulf %30, %31 : vector<2x8xf32>
    %33 = vector.shape_cast %32 : vector<2x8xf32> to vector<2x1x8xf32>
    %c0_14 = arith.constant 0 : index
    %c0_15 = arith.constant 0 : index
    %c0_16 = arith.constant 0 : index
    %34 = vector.load %arg4[%c0_14, %c0_15, %c0_16] : memref<2x32x96xbf16, #tpu.memory_space<vmem>>, vector<1x32x96xbf16>
    %35 = vector.shape_cast %34 : vector<1x32x96xbf16> to vector<32x96xbf16>
    %c0_17 = arith.constant 0 : index
    %c0_18 = arith.constant 0 : index
    %c0_19 = arith.constant 0 : index
    %36 = vector.load %arg6[%c0_17, %c0_18, %c0_19] : memref<2x32x32xbf16, #tpu.memory_space<vmem>>, vector<1x32x32xbf16>
    %37 = vector.shape_cast %36 : vector<1x32x32xbf16> to vector<32x32xbf16>
    %38 = arith.truncf %27 : vector<16x32xf32> to vector<16x32xbf16>
    %cst_20 = arith.constant dense<0.000000e+00> : vector<16x96xf32>
    %39 = tpu.matmul %38, %35, %cst_20 {dimension_numbers = #tpu.dot_dimension_numbers<[1], [0], [0], [1], [0, 0, 1, 1], [], []>} : vector<16x32xbf16>, vector<32x96xbf16>, vector<16x96xf32> -> vector<16x96xf32>
    %c0_21 = arith.constant 0 : index
    %c0_22 = arith.constant 0 : index
    %c0_23 = arith.constant 0 : index
    %40 = vector.load %arg5[%c0_21, %c0_22, %c0_23] : memref<2x1x96xf32, #tpu.memory_space<vmem>>, vector<1x1x96xf32>
    %41 = vector.shape_cast %40 : vector<1x1x96xf32> to vector<1x96xf32>
    %42 = vector.broadcast %41 : vector<1x96xf32> to vector<16x96xf32>
    %43 = arith.addf %39, %42 : vector<16x96xf32>
    %44 = vector.extract_strided_slice %43 {offsets = [0, 0], sizes = [16, 32], strides = [1, 1]} : vector<16x96xf32> to vector<16x32xf32>
    %cst_24 = arith.constant 0.353553385 : f32
    %45 = vector.broadcast %cst_24 : f32 to vector<16x32xf32>
    %46 = arith.mulf %44, %45 : vector<16x32xf32>
    %47 = vector.shape_cast %46 : vector<16x32xf32> to vector<2x8x32xf32>
    %48 = vector.extract_strided_slice %43 {offsets = [0, 32], sizes = [16, 32], strides = [1, 1]} : vector<16x96xf32> to vector<16x32xf32>
    %49 = vector.shape_cast %48 : vector<16x32xf32> to vector<2x8x32xf32>
    %50 = vector.extract_strided_slice %43 {offsets = [0, 64], sizes = [16, 32], strides = [1, 1]} : vector<16x96xf32> to vector<16x32xf32>
    %51 = vector.shape_cast %50 : vector<16x32xf32> to vector<2x8x32xf32>
    %cst_25 = arith.constant 0.000000e+00 : f32
    %52 = vector.broadcast %cst_25 : f32 to vector<16x32xf32>
    %53 = vector.extract_strided_slice %47 {offsets = [0, 0, 0], sizes = [2, 8, 8], strides = [1, 1, 1]} : vector<2x8x32xf32> to vector<2x8x8xf32>
    %54 = arith.truncf %53 : vector<2x8x8xf32> to vector<2x8x8xbf16>
    %55 = vector.extract_strided_slice %49 {offsets = [0, 0, 0], sizes = [2, 8, 8], strides = [1, 1, 1]} : vector<2x8x32xf32> to vector<2x8x8xf32>
    %56 = arith.truncf %55 : vector<2x8x8xf32> to vector<2x8x8xbf16>
    %57 = vector.extract_strided_slice %51 {offsets = [0, 0, 0], sizes = [2, 8, 8], strides = [1, 1, 1]} : vector<2x8x32xf32> to vector<2x8x8xf32>
    %58 = arith.truncf %57 : vector<2x8x8xf32> to vector<2x8x8xbf16>
    "tpu.trace_start"() <{level = 10 : i32, message = "bqd,bkd->bqk"}> : () -> ()
    %cst_26 = arith.constant dense<0.000000e+00> : vector<2x8x8xf32>
    %59 = tpu.matmul %54, %56, %cst_26 {dimension_numbers = #tpu.dot_dimension_numbers<[2], [2], [1], [1], [0, 0, 0, 1, 1, 1], [0], [0]>} : vector<2x8x8xbf16>, vector<2x8x8xbf16>, vector<2x8x8xf32> -> vector<2x8x8xf32>
    "tpu.trace_stop"() : () -> ()
    %60 = vector.broadcast %33 : vector<2x1x8xf32> to vector<2x8x8xf32>
    %61 = arith.addf %59, %60 : vector<2x8x8xf32>
    %cst_27 = arith.constant dense<0xFF800000> : vector<2x8xf32>
    %62 = vector.multi_reduction <maximumf>, %61, %cst_27 [2] : vector<2x8x8xf32> to vector<2x8xf32>
    %63 = vector.shape_cast %62 : vector<2x8xf32> to vector<2x8x1xf32>
    %64 = vector.broadcast %63 : vector<2x8x1xf32> to vector<2x8x8xf32>
    %65 = arith.subf %61, %64 : vector<2x8x8xf32>
    %66 = math.exp %65 : vector<2x8x8xf32>
    %cst_28 = arith.constant dense<0.000000e+00> : vector<2x8xf32>
    %67 = vector.multi_reduction <add>, %66, %cst_28 [2] : vector<2x8x8xf32> to vector<2x8xf32>
    %68 = vector.shape_cast %67 : vector<2x8xf32> to vector<2x8x1xf32>
    %69 = tpu.reciprocal %68 {approx = true} : vector<2x8x1xf32> -> vector<2x8x1xf32>
    %70 = vector.broadcast %69 : vector<2x8x1xf32> to vector<2x8x8xf32>
    %71 = arith.mulf %66, %70 : vector<2x8x8xf32>
    %72 = arith.truncf %71 : vector<2x8x8xf32> to vector<2x8x8xbf16>
    "tpu.trace_start"() <{level = 10 : i32, message = "bqk,bkd->bqd"}> : () -> ()
    %cst_29 = arith.constant dense<0.000000e+00> : vector<2x8x8xf32>
    %73 = tpu.matmul %72, %58, %cst_29 {dimension_numbers = #tpu.dot_dimension_numbers<[2], [1], [1], [2], [0, 0, 0, 1, 1, 2], [0], [0]>} : vector<2x8x8xbf16>, vector<2x8x8xbf16>, vector<2x8x8xf32> -> vector<2x8x8xf32>
    "tpu.trace_stop"() : () -> ()
    %74 = vector.shape_cast %73 : vector<2x8x8xf32> to vector<16x8xf32>
    %75 = arith.truncf %74 : vector<16x8xf32> to vector<16x8xbf16>
    %76 = vector.extract_strided_slice %37 {offsets = [0, 0], sizes = [8, 32], strides = [1, 1]} : vector<32x32xbf16> to vector<8x32xbf16>
    %cst_30 = arith.constant dense<0.000000e+00> : vector<16x32xf32>
    %77 = tpu.matmul %75, %76, %cst_30 {dimension_numbers = #tpu.dot_dimension_numbers<[1], [0], [0], [1], [0, 0, 1, 1], [], []>} : vector<16x8xbf16>, vector<8x32xbf16>, vector<16x32xf32> -> vector<16x32xf32>
    %78 = arith.addf %52, %77 : vector<16x32xf32>
    %79 = vector.extract_strided_slice %47 {offsets = [0, 0, 8], sizes = [2, 8, 8], strides = [1, 1, 1]} : vector<2x8x32xf32> to vector<2x8x8xf32>
    %80 = arith.truncf %79 : vector<2x8x8xf32> to vector<2x8x8xbf16>
    %81 = vector.extract_strided_slice %49 {offsets = [0, 0, 8], sizes = [2, 8, 8], strides = [1, 1, 1]} : vector<2x8x32xf32> to vector<2x8x8xf32>
    %82 = arith.truncf %81 : vector<2x8x8xf32> to vector<2x8x8xbf16>
    %83 = vector.extract_strided_slice %51 {offsets = [0, 0, 8], sizes = [2, 8, 8], strides = [1, 1, 1]} : vector<2x8x32xf32> to vector<2x8x8xf32>
    %84 = arith.truncf %83 : vector<2x8x8xf32> to vector<2x8x8xbf16>
    "tpu.trace_start"() <{level = 10 : i32, message = "bqd,bkd->bqk"}> : () -> ()
    %cst_31 = arith.constant dense<0.000000e+00> : vector<2x8x8xf32>
    %85 = tpu.matmul %80, %82, %cst_31 {dimension_numbers = #tpu.dot_dimension_numbers<[2], [2], [1], [1], [0, 0, 0, 1, 1, 1], [0], [0]>} : vector<2x8x8xbf16>, vector<2x8x8xbf16>, vector<2x8x8xf32> -> vector<2x8x8xf32>
    "tpu.trace_stop"() : () -> ()
    %86 = vector.broadcast %33 : vector<2x1x8xf32> to vector<2x8x8xf32>
    %87 = arith.addf %85, %86 : vector<2x8x8xf32>
    %cst_32 = arith.constant dense<0xFF800000> : vector<2x8xf32>
    %88 = vector.multi_reduction <maximumf>, %87, %cst_32 [2] : vector<2x8x8xf32> to vector<2x8xf32>
    %89 = vector.shape_cast %88 : vector<2x8xf32> to vector<2x8x1xf32>
    %90 = vector.broadcast %89 : vector<2x8x1xf32> to vector<2x8x8xf32>
    %91 = arith.subf %87, %90 : vector<2x8x8xf32>
    %92 = math.exp %91 : vector<2x8x8xf32>
    %cst_33 = arith.constant dense<0.000000e+00> : vector<2x8xf32>
    %93 = vector.multi_reduction <add>, %92, %cst_33 [2] : vector<2x8x8xf32> to vector<2x8xf32>
    %94 = vector.shape_cast %93 : vector<2x8xf32> to vector<2x8x1xf32>
    %95 = tpu.reciprocal %94 {approx = true} : vector<2x8x1xf32> -> vector<2x8x1xf32>
    %96 = vector.broadcast %95 : vector<2x8x1xf32> to vector<2x8x8xf32>
    %97 = arith.mulf %92, %96 : vector<2x8x8xf32>
    %98 = arith.truncf %97 : vector<2x8x8xf32> to vector<2x8x8xbf16>
    "tpu.trace_start"() <{level = 10 : i32, message = "bqk,bkd->bqd"}> : () -> ()
    %cst_34 = arith.constant dense<0.000000e+00> : vector<2x8x8xf32>
    %99 = tpu.matmul %98, %84, %cst_34 {dimension_numbers = #tpu.dot_dimension_numbers<[2], [1], [1], [2], [0, 0, 0, 1, 1, 2], [0], [0]>} : vector<2x8x8xbf16>, vector<2x8x8xbf16>, vector<2x8x8xf32> -> vector<2x8x8xf32>
    "tpu.trace_stop"() : () -> ()
    %100 = vector.shape_cast %99 : vector<2x8x8xf32> to vector<16x8xf32>
    %101 = arith.truncf %100 : vector<16x8xf32> to vector<16x8xbf16>
    %102 = vector.extract_strided_slice %37 {offsets = [8, 0], sizes = [8, 32], strides = [1, 1]} : vector<32x32xbf16> to vector<8x32xbf16>
    %cst_35 = arith.constant dense<0.000000e+00> : vector<16x32xf32>
    %103 = tpu.matmul %101, %102, %cst_35 {dimension_numbers = #tpu.dot_dimension_numbers<[1], [0], [0], [1], [0, 0, 1, 1], [], []>} : vector<16x8xbf16>, vector<8x32xbf16>, vector<16x32xf32> -> vector<16x32xf32>
    %104 = arith.addf %78, %103 : vector<16x32xf32>
    %105 = vector.extract_strided_slice %47 {offsets = [0, 0, 16], sizes = [2, 8, 8], strides = [1, 1, 1]} : vector<2x8x32xf32> to vector<2x8x8xf32>
    %106 = arith.truncf %105 : vector<2x8x8xf32> to vector<2x8x8xbf16>
    %107 = vector.extract_strided_slice %49 {offsets = [0, 0, 16], sizes = [2, 8, 8], strides = [1, 1, 1]} : vector<2x8x32xf32> to vector<2x8x8xf32>
    %108 = arith.truncf %107 : vector<2x8x8xf32> to vector<2x8x8xbf16>
    %109 = vector.extract_strided_slice %51 {offsets = [0, 0, 16], sizes = [2, 8, 8], strides = [1, 1, 1]} : vector<2x8x32xf32> to vector<2x8x8xf32>
    %110 = arith.truncf %109 : vector<2x8x8xf32> to vector<2x8x8xbf16>
    "tpu.trace_start"() <{level = 10 : i32, message = "bqd,bkd->bqk"}> : () -> ()
    %cst_36 = arith.constant dense<0.000000e+00> : vector<2x8x8xf32>
    %111 = tpu.matmul %106, %108, %cst_36 {dimension_numbers = #tpu.dot_dimension_numbers<[2], [2], [1], [1], [0, 0, 0, 1, 1, 1], [0], [0]>} : vector<2x8x8xbf16>, vector<2x8x8xbf16>, vector<2x8x8xf32> -> vector<2x8x8xf32>
    "tpu.trace_stop"() : () -> ()
    %112 = vector.broadcast %33 : vector<2x1x8xf32> to vector<2x8x8xf32>
    %113 = arith.addf %111, %112 : vector<2x8x8xf32>
    %cst_37 = arith.constant dense<0xFF800000> : vector<2x8xf32>
    %114 = vector.multi_reduction <maximumf>, %113, %cst_37 [2] : vector<2x8x8xf32> to vector<2x8xf32>
    %115 = vector.shape_cast %114 : vector<2x8xf32> to vector<2x8x1xf32>
    %116 = vector.broadcast %115 : vector<2x8x1xf32> to vector<2x8x8xf32>
    %117 = arith.subf %113, %116 : vector<2x8x8xf32>
    %118 = math.exp %117 : vector<2x8x8xf32>
    %cst_38 = arith.constant dense<0.000000e+00> : vector<2x8xf32>
    %119 = vector.multi_reduction <add>, %118, %cst_38 [2] : vector<2x8x8xf32> to vector<2x8xf32>
    %120 = vector.shape_cast %119 : vector<2x8xf32> to vector<2x8x1xf32>
    %121 = tpu.reciprocal %120 {approx = true} : vector<2x8x1xf32> -> vector<2x8x1xf32>
    %122 = vector.broadcast %121 : vector<2x8x1xf32> to vector<2x8x8xf32>
    %123 = arith.mulf %118, %122 : vector<2x8x8xf32>
    %124 = arith.truncf %123 : vector<2x8x8xf32> to vector<2x8x8xbf16>
    "tpu.trace_start"() <{level = 10 : i32, message = "bqk,bkd->bqd"}> : () -> ()
    %cst_39 = arith.constant dense<0.000000e+00> : vector<2x8x8xf32>
    %125 = tpu.matmul %124, %110, %cst_39 {dimension_numbers = #tpu.dot_dimension_numbers<[2], [1], [1], [2], [0, 0, 0, 1, 1, 2], [0], [0]>} : vector<2x8x8xbf16>, vector<2x8x8xbf16>, vector<2x8x8xf32> -> vector<2x8x8xf32>
    "tpu.trace_stop"() : () -> ()
    %126 = vector.shape_cast %125 : vector<2x8x8xf32> to vector<16x8xf32>
    %127 = arith.truncf %126 : vector<16x8xf32> to vector<16x8xbf16>
    %128 = vector.extract_strided_slice %37 {offsets = [16, 0], sizes = [8, 32], strides = [1, 1]} : vector<32x32xbf16> to vector<8x32xbf16>
    %cst_40 = arith.constant dense<0.000000e+00> : vector<16x32xf32>
    %129 = tpu.matmul %127, %128, %cst_40 {dimension_numbers = #tpu.dot_dimension_numbers<[1], [0], [0], [1], [0, 0, 1, 1], [], []>} : vector<16x8xbf16>, vector<8x32xbf16>, vector<16x32xf32> -> vector<16x32xf32>
    %130 = arith.addf %104, %129 : vector<16x32xf32>
    %131 = vector.extract_strided_slice %47 {offsets = [0, 0, 24], sizes = [2, 8, 8], strides = [1, 1, 1]} : vector<2x8x32xf32> to vector<2x8x8xf32>
    %132 = arith.truncf %131 : vector<2x8x8xf32> to vector<2x8x8xbf16>
    %133 = vector.extract_strided_slice %49 {offsets = [0, 0, 24], sizes = [2, 8, 8], strides = [1, 1, 1]} : vector<2x8x32xf32> to vector<2x8x8xf32>
    %134 = arith.truncf %133 : vector<2x8x8xf32> to vector<2x8x8xbf16>
    %135 = vector.extract_strided_slice %51 {offsets = [0, 0, 24], sizes = [2, 8, 8], strides = [1, 1, 1]} : vector<2x8x32xf32> to vector<2x8x8xf32>
    %136 = arith.truncf %135 : vector<2x8x8xf32> to vector<2x8x8xbf16>
    "tpu.trace_start"() <{level = 10 : i32, message = "bqd,bkd->bqk"}> : () -> ()
    %cst_41 = arith.constant dense<0.000000e+00> : vector<2x8x8xf32>
    %137 = tpu.matmul %132, %134, %cst_41 {dimension_numbers = #tpu.dot_dimension_numbers<[2], [2], [1], [1], [0, 0, 0, 1, 1, 1], [0], [0]>} : vector<2x8x8xbf16>, vector<2x8x8xbf16>, vector<2x8x8xf32> -> vector<2x8x8xf32>
    "tpu.trace_stop"() : () -> ()
    %138 = vector.broadcast %33 : vector<2x1x8xf32> to vector<2x8x8xf32>
    %139 = arith.addf %137, %138 : vector<2x8x8xf32>
    %cst_42 = arith.constant dense<0xFF800000> : vector<2x8xf32>
    %140 = vector.multi_reduction <maximumf>, %139, %cst_42 [2] : vector<2x8x8xf32> to vector<2x8xf32>
    %141 = vector.shape_cast %140 : vector<2x8xf32> to vector<2x8x1xf32>
    %142 = vector.broadcast %141 : vector<2x8x1xf32> to vector<2x8x8xf32>
    %143 = arith.subf %139, %142 : vector<2x8x8xf32>
    %144 = math.exp %143 : vector<2x8x8xf32>
    %cst_43 = arith.constant dense<0.000000e+00> : vector<2x8xf32>
    %145 = vector.multi_reduction <add>, %144, %cst_43 [2] : vector<2x8x8xf32> to vector<2x8xf32>
    %146 = vector.shape_cast %145 : vector<2x8xf32> to vector<2x8x1xf32>
    %147 = tpu.reciprocal %146 {approx = true} : vector<2x8x1xf32> -> vector<2x8x1xf32>
    %148 = vector.broadcast %147 : vector<2x8x1xf32> to vector<2x8x8xf32>
    %149 = arith.mulf %144, %148 : vector<2x8x8xf32>
    %150 = arith.truncf %149 : vector<2x8x8xf32> to vector<2x8x8xbf16>
    "tpu.trace_start"() <{level = 10 : i32, message = "bqk,bkd->bqd"}> : () -> ()
    %cst_44 = arith.constant dense<0.000000e+00> : vector<2x8x8xf32>
    %151 = tpu.matmul %150, %136, %cst_44 {dimension_numbers = #tpu.dot_dimension_numbers<[2], [1], [1], [2], [0, 0, 0, 1, 1, 2], [0], [0]>} : vector<2x8x8xbf16>, vector<2x8x8xbf16>, vector<2x8x8xf32> -> vector<2x8x8xf32>
    "tpu.trace_stop"() : () -> ()
    %152 = vector.shape_cast %151 : vector<2x8x8xf32> to vector<16x8xf32>
    %153 = arith.truncf %152 : vector<16x8xf32> to vector<16x8xbf16>
    %154 = vector.extract_strided_slice %37 {offsets = [24, 0], sizes = [8, 32], strides = [1, 1]} : vector<32x32xbf16> to vector<8x32xbf16>
    %cst_45 = arith.constant dense<0.000000e+00> : vector<16x32xf32>
    %155 = tpu.matmul %153, %154, %cst_45 {dimension_numbers = #tpu.dot_dimension_numbers<[1], [0], [0], [1], [0, 0, 1, 1], [], []>} : vector<16x8xbf16>, vector<8x32xbf16>, vector<16x32xf32> -> vector<16x32xf32>
    %156 = arith.addf %130, %155 : vector<16x32xf32>
    %c0_46 = arith.constant 0 : index
    %c0_47 = arith.constant 0 : index
    %c0_48 = arith.constant 0 : index
    %157 = vector.load %arg7[%c0_46, %c0_47, %c0_48] : memref<2x1x32xf32, #tpu.memory_space<vmem>>, vector<1x1x32xf32>
    %158 = vector.shape_cast %157 : vector<1x1x32xf32> to vector<1x32xf32>
    %159 = vector.broadcast %158 : vector<1x32xf32> to vector<16x32xf32>
    %160 = arith.addf %156, %159 : vector<16x32xf32>
    %161 = arith.addf %27, %160 : vector<16x32xf32>
    %c0_49 = arith.constant 0 : index
    %c0_50 = arith.constant 0 : index
    %c0_51 = arith.constant 0 : index
    %162 = vector.load %arg8[%c0_49, %c0_50, %c0_51] : memref<2x1x32xf32, #tpu.memory_space<vmem>>, vector<1x1x32xf32>
    %163 = vector.shape_cast %162 : vector<1x1x32xf32> to vector<1x32xf32>
    %c0_52 = arith.constant 0 : index
    %c0_53 = arith.constant 0 : index
    %c0_54 = arith.constant 0 : index
    %164 = vector.load %arg9[%c0_52, %c0_53, %c0_54] : memref<2x1x32xf32, #tpu.memory_space<vmem>>, vector<1x1x32xf32>
    %165 = vector.shape_cast %164 : vector<1x1x32xf32> to vector<1x32xf32>
    %cst_55 = arith.constant dense<0.000000e+00> : vector<16xf32>
    %166 = vector.multi_reduction <add>, %161, %cst_55 [1] : vector<16x32xf32> to vector<16xf32>
    %167 = vector.shape_cast %166 : vector<16xf32> to vector<16x1xf32>
    %cst_56 = arith.constant 3.200000e+01 : f32
    %168 = vector.broadcast %cst_56 : f32 to vector<16x1xf32>
    %169 = arith.divf %167, %168 : vector<16x1xf32>
    %170 = vector.broadcast %169 : vector<16x1xf32> to vector<16x32xf32>
    %171 = arith.subf %161, %170 : vector<16x32xf32>
    %172 = arith.mulf %171, %171 : vector<16x32xf32>
    %cst_57 = arith.constant dense<0.000000e+00> : vector<16xf32>
    %173 = vector.multi_reduction <add>, %172, %cst_57 [1] : vector<16x32xf32> to vector<16xf32>
    %174 = vector.shape_cast %173 : vector<16xf32> to vector<16x1xf32>
    %cst_58 = arith.constant 3.200000e+01 : f32
    %175 = vector.broadcast %cst_58 : f32 to vector<16x1xf32>
    %176 = arith.divf %174, %175 : vector<16x1xf32>
    %177 = vector.broadcast %169 : vector<16x1xf32> to vector<16x32xf32>
    %178 = arith.subf %161, %177 : vector<16x32xf32>
    %cst_59 = arith.constant 9.99999996E-13 : f32
    %179 = vector.broadcast %cst_59 : f32 to vector<16x1xf32>
    %180 = arith.addf %176, %179 : vector<16x1xf32>
    %181 = math.rsqrt %180 : vector<16x1xf32>
    %182 = vector.broadcast %181 : vector<16x1xf32> to vector<16x32xf32>
    %183 = arith.mulf %178, %182 : vector<16x32xf32>
    %184 = vector.broadcast %163 : vector<1x32xf32> to vector<16x32xf32>
    %185 = arith.mulf %183, %184 : vector<16x32xf32>
    %186 = vector.broadcast %165 : vector<1x32xf32> to vector<16x32xf32>
    %187 = arith.addf %185, %186 : vector<16x32xf32>
    %188 = arith.truncf %187 : vector<16x32xf32> to vector<16x32xbf16>
    %c0_60 = arith.constant 0 : index
    %c0_61 = arith.constant 0 : index
    %c0_62 = arith.constant 0 : index
    %189 = vector.load %arg10[%c0_60, %c0_61, %c0_62] : memref<2x32x128xbf16, #tpu.memory_space<vmem>>, vector<1x32x128xbf16>
    %190 = vector.shape_cast %189 : vector<1x32x128xbf16> to vector<32x128xbf16>
    %cst_63 = arith.constant dense<0.000000e+00> : vector<16x128xf32>
    %191 = tpu.matmul %188, %190, %cst_63 {dimension_numbers = #tpu.dot_dimension_numbers<[1], [0], [0], [1], [0, 0, 1, 1], [], []>} : vector<16x32xbf16>, vector<32x128xbf16>, vector<16x128xf32> -> vector<16x128xf32>
    %c0_64 = arith.constant 0 : index
    %c0_65 = arith.constant 0 : index
    %c0_66 = arith.constant 0 : index
    %192 = vector.load %arg11[%c0_64, %c0_65, %c0_66] : memref<2x1x128xf32, #tpu.memory_space<vmem>>, vector<1x1x128xf32>
    %193 = vector.shape_cast %192 : vector<1x1x128xf32> to vector<1x128xf32>
    %194 = vector.broadcast %193 : vector<1x128xf32> to vector<16x128xf32>
    %195 = arith.addf %191, %194 : vector<16x128xf32>
    %cst_67 = arith.constant 5.000000e-01 : f32
    %196 = vector.broadcast %cst_67 : f32 to vector<16x128xf32>
    %197 = arith.mulf %196, %195 : vector<16x128xf32>
    %cst_68 = arith.constant 4.471500e-02 : f32
    %198 = vector.broadcast %cst_68 : f32 to vector<16x128xf32>
    %199 = arith.mulf %198, %195 : vector<16x128xf32>
    %200 = arith.mulf %199, %195 : vector<16x128xf32>
    %201 = arith.mulf %200, %195 : vector<16x128xf32>
    %202 = arith.addf %195, %201 : vector<16x128xf32>
    %cst_69 = arith.constant 0.797884583 : f32
    %203 = vector.broadcast %cst_69 : f32 to vector<16x128xf32>
    %204 = arith.mulf %203, %202 : vector<16x128xf32>
    %205 = math.tanh %204 : vector<16x128xf32>
    %cst_70 = arith.constant 1.000000e+00 : f32
    %206 = vector.broadcast %cst_70 : f32 to vector<16x128xf32>
    %207 = arith.addf %206, %205 : vector<16x128xf32>
    %208 = arith.mulf %197, %207 : vector<16x128xf32>
    %209 = arith.truncf %208 : vector<16x128xf32> to vector<16x128xbf16>
    %c0_71 = arith.constant 0 : index
    %c0_72 = arith.constant 0 : index
    %c0_73 = arith.constant 0 : index
    %210 = vector.load %arg12[%c0_71, %c0_72, %c0_73] : memref<2x128x32xbf16, #tpu.memory_space<vmem>>, vector<1x128x32xbf16>
    %211 = vector.shape_cast %210 : vector<1x128x32xbf16> to vector<128x32xbf16>
    %cst_74 = arith.constant dense<0.000000e+00> : vector<16x32xf32>
    %212 = tpu.matmul %209, %211, %cst_74 {dimension_numbers = #tpu.dot_dimension_numbers<[1], [0], [0], [1], [0, 0, 1, 1], [], []>} : vector<16x128xbf16>, vector<128x32xbf16>, vector<16x32xf32> -> vector<16x32xf32>
    %c0_75 = arith.constant 0 : index
    %c0_76 = arith.constant 0 : index
    %c0_77 = arith.constant 0 : index
    %213 = vector.load %arg13[%c0_75, %c0_76, %c0_77] : memref<2x1x32xf32, #tpu.memory_space<vmem>>, vector<1x1x32xf32>
    %214 = vector.shape_cast %213 : vector<1x1x32xf32> to vector<1x32xf32>
    %215 = vector.broadcast %214 : vector<1x32xf32> to vector<16x32xf32>
    %216 = arith.addf %212, %215 : vector<16x32xf32>
    %217 = arith.addf %187, %216 : vector<16x32xf32>
    %c0_78 = arith.constant 0 : index
    %c0_79 = arith.constant 0 : index
    %c0_80 = arith.constant 0 : index
    %218 = vector.load %arg14[%c0_78, %c0_79, %c0_80] : memref<2x1x32xf32, #tpu.memory_space<vmem>>, vector<1x1x32xf32>
    %219 = vector.shape_cast %218 : vector<1x1x32xf32> to vector<1x32xf32>
    %c0_81 = arith.constant 0 : index
    %c0_82 = arith.constant 0 : index
    %c0_83 = arith.constant 0 : index
    %220 = vector.load %arg15[%c0_81, %c0_82, %c0_83] : memref<2x1x32xf32, #tpu.memory_space<vmem>>, vector<1x1x32xf32>
    %221 = vector.shape_cast %220 : vector<1x1x32xf32> to vector<1x32xf32>
    %cst_84 = arith.constant dense<0.000000e+00> : vector<16xf32>
    %222 = vector.multi_reduction <add>, %217, %cst_84 [1] : vector<16x32xf32> to vector<16xf32>
    %223 = vector.shape_cast %222 : vector<16xf32> to vector<16x1xf32>
    %cst_85 = arith.constant 3.200000e+01 : f32
    %224 = vector.broadcast %cst_85 : f32 to vector<16x1xf32>
    %225 = arith.divf %223, %224 : vector<16x1xf32>
    %226 = vector.broadcast %225 : vector<16x1xf32> to vector<16x32xf32>
    %227 = arith.subf %217, %226 : vector<16x32xf32>
    %228 = arith.mulf %227, %227 : vector<16x32xf32>
    %cst_86 = arith.constant dense<0.000000e+00> : vector<16xf32>
    %229 = vector.multi_reduction <add>, %228, %cst_86 [1] : vector<16x32xf32> to vector<16xf32>
    %230 = vector.shape_cast %229 : vector<16xf32> to vector<16x1xf32>
    %cst_87 = arith.constant 3.200000e+01 : f32
    %231 = vector.broadcast %cst_87 : f32 to vector<16x1xf32>
    %232 = arith.divf %230, %231 : vector<16x1xf32>
    %233 = vector.broadcast %225 : vector<16x1xf32> to vector<16x32xf32>
    %234 = arith.subf %217, %233 : vector<16x32xf32>
    %cst_88 = arith.constant 9.99999996E-13 : f32
    %235 = vector.broadcast %cst_88 : f32 to vector<16x1xf32>
    %236 = arith.addf %232, %235 : vector<16x1xf32>
    %237 = math.rsqrt %236 : vector<16x1xf32>
    %238 = vector.broadcast %237 : vector<16x1xf32> to vector<16x32xf32>
    %239 = arith.mulf %234, %238 : vector<16x32xf32>
    %240 = vector.broadcast %219 : vector<1x32xf32> to vector<16x32xf32>
    %241 = arith.mulf %239, %240 : vector<16x32xf32>
    %242 = vector.broadcast %221 : vector<1x32xf32> to vector<16x32xf32>
    %243 = arith.addf %241, %242 : vector<16x32xf32>
    %c1 = arith.constant 1 : index
    %c0_89 = arith.constant 0 : index
    %c0_90 = arith.constant 0 : index
    %244 = vector.load %arg4[%c1, %c0_89, %c0_90] : memref<2x32x96xbf16, #tpu.memory_space<vmem>>, vector<1x32x96xbf16>
    %245 = vector.shape_cast %244 : vector<1x32x96xbf16> to vector<32x96xbf16>
    %c1_91 = arith.constant 1 : index
    %c0_92 = arith.constant 0 : index
    %c0_93 = arith.constant 0 : index
    %246 = vector.load %arg6[%c1_91, %c0_92, %c0_93] : memref<2x32x32xbf16, #tpu.memory_space<vmem>>, vector<1x32x32xbf16>
    %247 = vector.shape_cast %246 : vector<1x32x32xbf16> to vector<32x32xbf16>
    %248 = arith.truncf %243 : vector<16x32xf32> to vector<16x32xbf16>
    %cst_94 = arith.constant dense<0.000000e+00> : vector<16x96xf32>
    %249 = tpu.matmul %248, %245, %cst_94 {dimension_numbers = #tpu.dot_dimension_numbers<[1], [0], [0], [1], [0, 0, 1, 1], [], []>} : vector<16x32xbf16>, vector<32x96xbf16>, vector<16x96xf32> -> vector<16x96xf32>
    %c1_95 = arith.constant 1 : index
    %c0_96 = arith.constant 0 : index
    %c0_97 = arith.constant 0 : index
    %250 = vector.load %arg5[%c1_95, %c0_96, %c0_97] : memref<2x1x96xf32, #tpu.memory_space<vmem>>, vector<1x1x96xf32>
    %251 = vector.shape_cast %250 : vector<1x1x96xf32> to vector<1x96xf32>
    %252 = vector.broadcast %251 : vector<1x96xf32> to vector<16x96xf32>
    %253 = arith.addf %249, %252 : vector<16x96xf32>
    %254 = vector.extract_strided_slice %253 {offsets = [0, 0], sizes = [16, 32], strides = [1, 1]} : vector<16x96xf32> to vector<16x32xf32>
    %cst_98 = arith.constant 0.353553385 : f32
    %255 = vector.broadcast %cst_98 : f32 to vector<16x32xf32>
    %256 = arith.mulf %254, %255 : vector<16x32xf32>
    %257 = vector.shape_cast %256 : vector<16x32xf32> to vector<2x8x32xf32>
    %258 = vector.extract_strided_slice %253 {offsets = [0, 32], sizes = [16, 32], strides = [1, 1]} : vector<16x96xf32> to vector<16x32xf32>
    %259 = vector.shape_cast %258 : vector<16x32xf32> to vector<2x8x32xf32>
    %260 = vector.extract_strided_slice %253 {offsets = [0, 64], sizes = [16, 32], strides = [1, 1]} : vector<16x96xf32> to vector<16x32xf32>
    %261 = vector.shape_cast %260 : vector<16x32xf32> to vector<2x8x32xf32>
    %cst_99 = arith.constant 0.000000e+00 : f32
    %262 = vector.broadcast %cst_99 : f32 to vector<16x32xf32>
    %263 = vector.extract_strided_slice %257 {offsets = [0, 0, 0], sizes = [2, 8, 8], strides = [1, 1, 1]} : vector<2x8x32xf32> to vector<2x8x8xf32>
    %264 = arith.truncf %263 : vector<2x8x8xf32> to vector<2x8x8xbf16>
    %265 = vector.extract_strided_slice %259 {offsets = [0, 0, 0], sizes = [2, 8, 8], strides = [1, 1, 1]} : vector<2x8x32xf32> to vector<2x8x8xf32>
    %266 = arith.truncf %265 : vector<2x8x8xf32> to vector<2x8x8xbf16>
    %267 = vector.extract_strided_slice %261 {offsets = [0, 0, 0], sizes = [2, 8, 8], strides = [1, 1, 1]} : vector<2x8x32xf32> to vector<2x8x8xf32>
    %268 = arith.truncf %267 : vector<2x8x8xf32> to vector<2x8x8xbf16>
    "tpu.trace_start"() <{level = 10 : i32, message = "bqd,bkd->bqk"}> : () -> ()
    %cst_100 = arith.constant dense<0.000000e+00> : vector<2x8x8xf32>
    %269 = tpu.matmul %264, %266, %cst_100 {dimension_numbers = #tpu.dot_dimension_numbers<[2], [2], [1], [1], [0, 0, 0, 1, 1, 1], [0], [0]>} : vector<2x8x8xbf16>, vector<2x8x8xbf16>, vector<2x8x8xf32> -> vector<2x8x8xf32>
    "tpu.trace_stop"() : () -> ()
    %270 = vector.broadcast %33 : vector<2x1x8xf32> to vector<2x8x8xf32>
    %271 = arith.addf %269, %270 : vector<2x8x8xf32>
    %cst_101 = arith.constant dense<0xFF800000> : vector<2x8xf32>
    %272 = vector.multi_reduction <maximumf>, %271, %cst_101 [2] : vector<2x8x8xf32> to vector<2x8xf32>
    %273 = vector.shape_cast %272 : vector<2x8xf32> to vector<2x8x1xf32>
    %274 = vector.broadcast %273 : vector<2x8x1xf32> to vector<2x8x8xf32>
    %275 = arith.subf %271, %274 : vector<2x8x8xf32>
    %276 = math.exp %275 : vector<2x8x8xf32>
    %cst_102 = arith.constant dense<0.000000e+00> : vector<2x8xf32>
    %277 = vector.multi_reduction <add>, %276, %cst_102 [2] : vector<2x8x8xf32> to vector<2x8xf32>
    %278 = vector.shape_cast %277 : vector<2x8xf32> to vector<2x8x1xf32>
    %279 = tpu.reciprocal %278 {approx = true} : vector<2x8x1xf32> -> vector<2x8x1xf32>
    %280 = vector.broadcast %279 : vector<2x8x1xf32> to vector<2x8x8xf32>
    %281 = arith.mulf %276, %280 : vector<2x8x8xf32>
    %282 = arith.truncf %281 : vector<2x8x8xf32> to vector<2x8x8xbf16>
    "tpu.trace_start"() <{level = 10 : i32, message = "bqk,bkd->bqd"}> : () -> ()
    %cst_103 = arith.constant dense<0.000000e+00> : vector<2x8x8xf32>
    %283 = tpu.matmul %282, %268, %cst_103 {dimension_numbers = #tpu.dot_dimension_numbers<[2], [1], [1], [2], [0, 0, 0, 1, 1, 2], [0], [0]>} : vector<2x8x8xbf16>, vector<2x8x8xbf16>, vector<2x8x8xf32> -> vector<2x8x8xf32>
    "tpu.trace_stop"() : () -> ()
    %284 = vector.shape_cast %283 : vector<2x8x8xf32> to vector<16x8xf32>
    %285 = arith.truncf %284 : vector<16x8xf32> to vector<16x8xbf16>
    %286 = vector.extract_strided_slice %247 {offsets = [0, 0], sizes = [8, 32], strides = [1, 1]} : vector<32x32xbf16> to vector<8x32xbf16>
    %cst_104 = arith.constant dense<0.000000e+00> : vector<16x32xf32>
    %287 = tpu.matmul %285, %286, %cst_104 {dimension_numbers = #tpu.dot_dimension_numbers<[1], [0], [0], [1], [0, 0, 1, 1], [], []>} : vector<16x8xbf16>, vector<8x32xbf16>, vector<16x32xf32> -> vector<16x32xf32>
    %288 = arith.addf %262, %287 : vector<16x32xf32>
    %289 = vector.extract_strided_slice %257 {offsets = [0, 0, 8], sizes = [2, 8, 8], strides = [1, 1, 1]} : vector<2x8x32xf32> to vector<2x8x8xf32>
    %290 = arith.truncf %289 : vector<2x8x8xf32> to vector<2x8x8xbf16>
    %291 = vector.extract_strided_slice %259 {offsets = [0, 0, 8], sizes = [2, 8, 8], strides = [1, 1, 1]} : vector<2x8x32xf32> to vector<2x8x8xf32>
    %292 = arith.truncf %291 : vector<2x8x8xf32> to vector<2x8x8xbf16>
    %293 = vector.extract_strided_slice %261 {offsets = [0, 0, 8], sizes = [2, 8, 8], strides = [1, 1, 1]} : vector<2x8x32xf32> to vector<2x8x8xf32>
    %294 = arith.truncf %293 : vector<2x8x8xf32> to vector<2x8x8xbf16>
    "tpu.trace_start"() <{level = 10 : i32, message = "bqd,bkd->bqk"}> : () -> ()
    %cst_105 = arith.constant dense<0.000000e+00> : vector<2x8x8xf32>
    %295 = tpu.matmul %290, %292, %cst_105 {dimension_numbers = #tpu.dot_dimension_numbers<[2], [2], [1], [1], [0, 0, 0, 1, 1, 1], [0], [0]>} : vector<2x8x8xbf16>, vector<2x8x8xbf16>, vector<2x8x8xf32> -> vector<2x8x8xf32>
    "tpu.trace_stop"() : () -> ()
    %296 = vector.broadcast %33 : vector<2x1x8xf32> to vector<2x8x8xf32>
    %297 = arith.addf %295, %296 : vector<2x8x8xf32>
    %cst_106 = arith.constant dense<0xFF800000> : vector<2x8xf32>
    %298 = vector.multi_reduction <maximumf>, %297, %cst_106 [2] : vector<2x8x8xf32> to vector<2x8xf32>
    %299 = vector.shape_cast %298 : vector<2x8xf32> to vector<2x8x1xf32>
    %300 = vector.broadcast %299 : vector<2x8x1xf32> to vector<2x8x8xf32>
    %301 = arith.subf %297, %300 : vector<2x8x8xf32>
    %302 = math.exp %301 : vector<2x8x8xf32>
    %cst_107 = arith.constant dense<0.000000e+00> : vector<2x8xf32>
    %303 = vector.multi_reduction <add>, %302, %cst_107 [2] : vector<2x8x8xf32> to vector<2x8xf32>
    %304 = vector.shape_cast %303 : vector<2x8xf32> to vector<2x8x1xf32>
    %305 = tpu.reciprocal %304 {approx = true} : vector<2x8x1xf32> -> vector<2x8x1xf32>
    %306 = vector.broadcast %305 : vector<2x8x1xf32> to vector<2x8x8xf32>
    %307 = arith.mulf %302, %306 : vector<2x8x8xf32>
    %308 = arith.truncf %307 : vector<2x8x8xf32> to vector<2x8x8xbf16>
    "tpu.trace_start"() <{level = 10 : i32, message = "bqk,bkd->bqd"}> : () -> ()
    %cst_108 = arith.constant dense<0.000000e+00> : vector<2x8x8xf32>
    %309 = tpu.matmul %308, %294, %cst_108 {dimension_numbers = #tpu.dot_dimension_numbers<[2], [1], [1], [2], [0, 0, 0, 1, 1, 2], [0], [0]>} : vector<2x8x8xbf16>, vector<2x8x8xbf16>, vector<2x8x8xf32> -> vector<2x8x8xf32>
    "tpu.trace_stop"() : () -> ()
    %310 = vector.shape_cast %309 : vector<2x8x8xf32> to vector<16x8xf32>
    %311 = arith.truncf %310 : vector<16x8xf32> to vector<16x8xbf16>
    %312 = vector.extract_strided_slice %247 {offsets = [8, 0], sizes = [8, 32], strides = [1, 1]} : vector<32x32xbf16> to vector<8x32xbf16>
    %cst_109 = arith.constant dense<0.000000e+00> : vector<16x32xf32>
    %313 = tpu.matmul %311, %312, %cst_109 {dimension_numbers = #tpu.dot_dimension_numbers<[1], [0], [0], [1], [0, 0, 1, 1], [], []>} : vector<16x8xbf16>, vector<8x32xbf16>, vector<16x32xf32> -> vector<16x32xf32>
    %314 = arith.addf %288, %313 : vector<16x32xf32>
    %315 = vector.extract_strided_slice %257 {offsets = [0, 0, 16], sizes = [2, 8, 8], strides = [1, 1, 1]} : vector<2x8x32xf32> to vector<2x8x8xf32>
    %316 = arith.truncf %315 : vector<2x8x8xf32> to vector<2x8x8xbf16>
    %317 = vector.extract_strided_slice %259 {offsets = [0, 0, 16], sizes = [2, 8, 8], strides = [1, 1, 1]} : vector<2x8x32xf32> to vector<2x8x8xf32>
    %318 = arith.truncf %317 : vector<2x8x8xf32> to vector<2x8x8xbf16>
    %319 = vector.extract_strided_slice %261 {offsets = [0, 0, 16], sizes = [2, 8, 8], strides = [1, 1, 1]} : vector<2x8x32xf32> to vector<2x8x8xf32>
    %320 = arith.truncf %319 : vector<2x8x8xf32> to vector<2x8x8xbf16>
    "tpu.trace_start"() <{level = 10 : i32, message = "bqd,bkd->bqk"}> : () -> ()
    %cst_110 = arith.constant dense<0.000000e+00> : vector<2x8x8xf32>
    %321 = tpu.matmul %316, %318, %cst_110 {dimension_numbers = #tpu.dot_dimension_numbers<[2], [2], [1], [1], [0, 0, 0, 1, 1, 1], [0], [0]>} : vector<2x8x8xbf16>, vector<2x8x8xbf16>, vector<2x8x8xf32> -> vector<2x8x8xf32>
    "tpu.trace_stop"() : () -> ()
    %322 = vector.broadcast %33 : vector<2x1x8xf32> to vector<2x8x8xf32>
    %323 = arith.addf %321, %322 : vector<2x8x8xf32>
    %cst_111 = arith.constant dense<0xFF800000> : vector<2x8xf32>
    %324 = vector.multi_reduction <maximumf>, %323, %cst_111 [2] : vector<2x8x8xf32> to vector<2x8xf32>
    %325 = vector.shape_cast %324 : vector<2x8xf32> to vector<2x8x1xf32>
    %326 = vector.broadcast %325 : vector<2x8x1xf32> to vector<2x8x8xf32>
    %327 = arith.subf %323, %326 : vector<2x8x8xf32>
    %328 = math.exp %327 : vector<2x8x8xf32>
    %cst_112 = arith.constant dense<0.000000e+00> : vector<2x8xf32>
    %329 = vector.multi_reduction <add>, %328, %cst_112 [2] : vector<2x8x8xf32> to vector<2x8xf32>
    %330 = vector.shape_cast %329 : vector<2x8xf32> to vector<2x8x1xf32>
    %331 = tpu.reciprocal %330 {approx = true} : vector<2x8x1xf32> -> vector<2x8x1xf32>
    %332 = vector.broadcast %331 : vector<2x8x1xf32> to vector<2x8x8xf32>
    %333 = arith.mulf %328, %332 : vector<2x8x8xf32>
    %334 = arith.truncf %333 : vector<2x8x8xf32> to vector<2x8x8xbf16>
    "tpu.trace_start"() <{level = 10 : i32, message = "bqk,bkd->bqd"}> : () -> ()
    %cst_113 = arith.constant dense<0.000000e+00> : vector<2x8x8xf32>
    %335 = tpu.matmul %334, %320, %cst_113 {dimension_numbers = #tpu.dot_dimension_numbers<[2], [1], [1], [2], [0, 0, 0, 1, 1, 2], [0], [0]>} : vector<2x8x8xbf16>, vector<2x8x8xbf16>, vector<2x8x8xf32> -> vector<2x8x8xf32>
    "tpu.trace_stop"() : () -> ()
    %336 = vector.shape_cast %335 : vector<2x8x8xf32> to vector<16x8xf32>
    %337 = arith.truncf %336 : vector<16x8xf32> to vector<16x8xbf16>
    %338 = vector.extract_strided_slice %247 {offsets = [16, 0], sizes = [8, 32], strides = [1, 1]} : vector<32x32xbf16> to vector<8x32xbf16>
    %cst_114 = arith.constant dense<0.000000e+00> : vector<16x32xf32>
    %339 = tpu.matmul %337, %338, %cst_114 {dimension_numbers = #tpu.dot_dimension_numbers<[1], [0], [0], [1], [0, 0, 1, 1], [], []>} : vector<16x8xbf16>, vector<8x32xbf16>, vector<16x32xf32> -> vector<16x32xf32>
    %340 = arith.addf %314, %339 : vector<16x32xf32>
    %341 = vector.extract_strided_slice %257 {offsets = [0, 0, 24], sizes = [2, 8, 8], strides = [1, 1, 1]} : vector<2x8x32xf32> to vector<2x8x8xf32>
    %342 = arith.truncf %341 : vector<2x8x8xf32> to vector<2x8x8xbf16>
    %343 = vector.extract_strided_slice %259 {offsets = [0, 0, 24], sizes = [2, 8, 8], strides = [1, 1, 1]} : vector<2x8x32xf32> to vector<2x8x8xf32>
    %344 = arith.truncf %343 : vector<2x8x8xf32> to vector<2x8x8xbf16>
    %345 = vector.extract_strided_slice %261 {offsets = [0, 0, 24], sizes = [2, 8, 8], strides = [1, 1, 1]} : vector<2x8x32xf32> to vector<2x8x8xf32>
    %346 = arith.truncf %345 : vector<2x8x8xf32> to vector<2x8x8xbf16>
    "tpu.trace_start"() <{level = 10 : i32, message = "bqd,bkd->bqk"}> : () -> ()
    %cst_115 = arith.constant dense<0.000000e+00> : vector<2x8x8xf32>
    %347 = tpu.matmul %342, %344, %cst_115 {dimension_numbers = #tpu.dot_dimension_numbers<[2], [2], [1], [1], [0, 0, 0, 1, 1, 1], [0], [0]>} : vector<2x8x8xbf16>, vector<2x8x8xbf16>, vector<2x8x8xf32> -> vector<2x8x8xf32>
    "tpu.trace_stop"() : () -> ()
    %348 = vector.broadcast %33 : vector<2x1x8xf32> to vector<2x8x8xf32>
    %349 = arith.addf %347, %348 : vector<2x8x8xf32>
    %cst_116 = arith.constant dense<0xFF800000> : vector<2x8xf32>
    %350 = vector.multi_reduction <maximumf>, %349, %cst_116 [2] : vector<2x8x8xf32> to vector<2x8xf32>
    %351 = vector.shape_cast %350 : vector<2x8xf32> to vector<2x8x1xf32>
    %352 = vector.broadcast %351 : vector<2x8x1xf32> to vector<2x8x8xf32>
    %353 = arith.subf %349, %352 : vector<2x8x8xf32>
    %354 = math.exp %353 : vector<2x8x8xf32>
    %cst_117 = arith.constant dense<0.000000e+00> : vector<2x8xf32>
    %355 = vector.multi_reduction <add>, %354, %cst_117 [2] : vector<2x8x8xf32> to vector<2x8xf32>
    %356 = vector.shape_cast %355 : vector<2x8xf32> to vector<2x8x1xf32>
    %357 = tpu.reciprocal %356 {approx = true} : vector<2x8x1xf32> -> vector<2x8x1xf32>
    %358 = vector.broadcast %357 : vector<2x8x1xf32> to vector<2x8x8xf32>
    %359 = arith.mulf %354, %358 : vector<2x8x8xf32>
    %360 = arith.truncf %359 : vector<2x8x8xf32> to vector<2x8x8xbf16>
    "tpu.trace_start"() <{level = 10 : i32, message = "bqk,bkd->bqd"}> : () -> ()
    %cst_118 = arith.constant dense<0.000000e+00> : vector<2x8x8xf32>
    %361 = tpu.matmul %360, %346, %cst_118 {dimension_numbers = #tpu.dot_dimension_numbers<[2], [1], [1], [2], [0, 0, 0, 1, 1, 2], [0], [0]>} : vector<2x8x8xbf16>, vector<2x8x8xbf16>, vector<2x8x8xf32> -> vector<2x8x8xf32>
    "tpu.trace_stop"() : () -> ()
    %362 = vector.shape_cast %361 : vector<2x8x8xf32> to vector<16x8xf32>
    %363 = arith.truncf %362 : vector<16x8xf32> to vector<16x8xbf16>
    %364 = vector.extract_strided_slice %247 {offsets = [24, 0], sizes = [8, 32], strides = [1, 1]} : vector<32x32xbf16> to vector<8x32xbf16>
    %cst_119 = arith.constant dense<0.000000e+00> : vector<16x32xf32>
    %365 = tpu.matmul %363, %364, %cst_119 {dimension_numbers = #tpu.dot_dimension_numbers<[1], [0], [0], [1], [0, 0, 1, 1], [], []>} : vector<16x8xbf16>, vector<8x32xbf16>, vector<16x32xf32> -> vector<16x32xf32>
    %366 = arith.addf %340, %365 : vector<16x32xf32>
    %c1_120 = arith.constant 1 : index
    %c0_121 = arith.constant 0 : index
    %c0_122 = arith.constant 0 : index
    %367 = vector.load %arg7[%c1_120, %c0_121, %c0_122] : memref<2x1x32xf32, #tpu.memory_space<vmem>>, vector<1x1x32xf32>
    %368 = vector.shape_cast %367 : vector<1x1x32xf32> to vector<1x32xf32>
    %369 = vector.broadcast %368 : vector<1x32xf32> to vector<16x32xf32>
    %370 = arith.addf %366, %369 : vector<16x32xf32>
    %371 = arith.addf %243, %370 : vector<16x32xf32>
    %c1_123 = arith.constant 1 : index
    %c0_124 = arith.constant 0 : index
    %c0_125 = arith.constant 0 : index
    %372 = vector.load %arg8[%c1_123, %c0_124, %c0_125] : memref<2x1x32xf32, #tpu.memory_space<vmem>>, vector<1x1x32xf32>
    %373 = vector.shape_cast %372 : vector<1x1x32xf32> to vector<1x32xf32>
    %c1_126 = arith.constant 1 : index
    %c0_127 = arith.constant 0 : index
    %c0_128 = arith.constant 0 : index
    %374 = vector.load %arg9[%c1_126, %c0_127, %c0_128] : memref<2x1x32xf32, #tpu.memory_space<vmem>>, vector<1x1x32xf32>
    %375 = vector.shape_cast %374 : vector<1x1x32xf32> to vector<1x32xf32>
    %cst_129 = arith.constant dense<0.000000e+00> : vector<16xf32>
    %376 = vector.multi_reduction <add>, %371, %cst_129 [1] : vector<16x32xf32> to vector<16xf32>
    %377 = vector.shape_cast %376 : vector<16xf32> to vector<16x1xf32>
    %cst_130 = arith.constant 3.200000e+01 : f32
    %378 = vector.broadcast %cst_130 : f32 to vector<16x1xf32>
    %379 = arith.divf %377, %378 : vector<16x1xf32>
    %380 = vector.broadcast %379 : vector<16x1xf32> to vector<16x32xf32>
    %381 = arith.subf %371, %380 : vector<16x32xf32>
    %382 = arith.mulf %381, %381 : vector<16x32xf32>
    %cst_131 = arith.constant dense<0.000000e+00> : vector<16xf32>
    %383 = vector.multi_reduction <add>, %382, %cst_131 [1] : vector<16x32xf32> to vector<16xf32>
    %384 = vector.shape_cast %383 : vector<16xf32> to vector<16x1xf32>
    %cst_132 = arith.constant 3.200000e+01 : f32
    %385 = vector.broadcast %cst_132 : f32 to vector<16x1xf32>
    %386 = arith.divf %384, %385 : vector<16x1xf32>
    %387 = vector.broadcast %379 : vector<16x1xf32> to vector<16x32xf32>
    %388 = arith.subf %371, %387 : vector<16x32xf32>
    %cst_133 = arith.constant 9.99999996E-13 : f32
    %389 = vector.broadcast %cst_133 : f32 to vector<16x1xf32>
    %390 = arith.addf %386, %389 : vector<16x1xf32>
    %391 = math.rsqrt %390 : vector<16x1xf32>
    %392 = vector.broadcast %391 : vector<16x1xf32> to vector<16x32xf32>
    %393 = arith.mulf %388, %392 : vector<16x32xf32>
    %394 = vector.broadcast %373 : vector<1x32xf32> to vector<16x32xf32>
    %395 = arith.mulf %393, %394 : vector<16x32xf32>
    %396 = vector.broadcast %375 : vector<1x32xf32> to vector<16x32xf32>
    %397 = arith.addf %395, %396 : vector<16x32xf32>
    %398 = arith.truncf %397 : vector<16x32xf32> to vector<16x32xbf16>
    %c1_134 = arith.constant 1 : index
    %c0_135 = arith.constant 0 : index
    %c0_136 = arith.constant 0 : index
    %399 = vector.load %arg10[%c1_134, %c0_135, %c0_136] : memref<2x32x128xbf16, #tpu.memory_space<vmem>>, vector<1x32x128xbf16>
    %400 = vector.shape_cast %399 : vector<1x32x128xbf16> to vector<32x128xbf16>
    %cst_137 = arith.constant dense<0.000000e+00> : vector<16x128xf32>
    %401 = tpu.matmul %398, %400, %cst_137 {dimension_numbers = #tpu.dot_dimension_numbers<[1], [0], [0], [1], [0, 0, 1, 1], [], []>} : vector<16x32xbf16>, vector<32x128xbf16>, vector<16x128xf32> -> vector<16x128xf32>
    %c1_138 = arith.constant 1 : index
    %c0_139 = arith.constant 0 : index
    %c0_140 = arith.constant 0 : index
    %402 = vector.load %arg11[%c1_138, %c0_139, %c0_140] : memref<2x1x128xf32, #tpu.memory_space<vmem>>, vector<1x1x128xf32>
    %403 = vector.shape_cast %402 : vector<1x1x128xf32> to vector<1x128xf32>
    %404 = vector.broadcast %403 : vector<1x128xf32> to vector<16x128xf32>
    %405 = arith.addf %401, %404 : vector<16x128xf32>
    %cst_141 = arith.constant 5.000000e-01 : f32
    %406 = vector.broadcast %cst_141 : f32 to vector<16x128xf32>
    %407 = arith.mulf %406, %405 : vector<16x128xf32>
    %cst_142 = arith.constant 4.471500e-02 : f32
    %408 = vector.broadcast %cst_142 : f32 to vector<16x128xf32>
    %409 = arith.mulf %408, %405 : vector<16x128xf32>
    %410 = arith.mulf %409, %405 : vector<16x128xf32>
    %411 = arith.mulf %410, %405 : vector<16x128xf32>
    %412 = arith.addf %405, %411 : vector<16x128xf32>
    %cst_143 = arith.constant 0.797884583 : f32
    %413 = vector.broadcast %cst_143 : f32 to vector<16x128xf32>
    %414 = arith.mulf %413, %412 : vector<16x128xf32>
    %415 = math.tanh %414 : vector<16x128xf32>
    %cst_144 = arith.constant 1.000000e+00 : f32
    %416 = vector.broadcast %cst_144 : f32 to vector<16x128xf32>
    %417 = arith.addf %416, %415 : vector<16x128xf32>
    %418 = arith.mulf %407, %417 : vector<16x128xf32>
    %419 = arith.truncf %418 : vector<16x128xf32> to vector<16x128xbf16>
    %c1_145 = arith.constant 1 : index
    %c0_146 = arith.constant 0 : index
    %c0_147 = arith.constant 0 : index
    %420 = vector.load %arg12[%c1_145, %c0_146, %c0_147] : memref<2x128x32xbf16, #tpu.memory_space<vmem>>, vector<1x128x32xbf16>
    %421 = vector.shape_cast %420 : vector<1x128x32xbf16> to vector<128x32xbf16>
    %cst_148 = arith.constant dense<0.000000e+00> : vector<16x32xf32>
    %422 = tpu.matmul %419, %421, %cst_148 {dimension_numbers = #tpu.dot_dimension_numbers<[1], [0], [0], [1], [0, 0, 1, 1], [], []>} : vector<16x128xbf16>, vector<128x32xbf16>, vector<16x32xf32> -> vector<16x32xf32>
    %c1_149 = arith.constant 1 : index
    %c0_150 = arith.constant 0 : index
    %c0_151 = arith.constant 0 : index
    %423 = vector.load %arg13[%c1_149, %c0_150, %c0_151] : memref<2x1x32xf32, #tpu.memory_space<vmem>>, vector<1x1x32xf32>
    %424 = vector.shape_cast %423 : vector<1x1x32xf32> to vector<1x32xf32>
    %425 = vector.broadcast %424 : vector<1x32xf32> to vector<16x32xf32>
    %426 = arith.addf %422, %425 : vector<16x32xf32>
    %427 = arith.addf %397, %426 : vector<16x32xf32>
    %c1_152 = arith.constant 1 : index
    %c0_153 = arith.constant 0 : index
    %c0_154 = arith.constant 0 : index
    %428 = vector.load %arg14[%c1_152, %c0_153, %c0_154] : memref<2x1x32xf32, #tpu.memory_space<vmem>>, vector<1x1x32xf32>
    %429 = vector.shape_cast %428 : vector<1x1x32xf32> to vector<1x32xf32>
    %c1_155 = arith.constant 1 : index
    %c0_156 = arith.constant 0 : index
    %c0_157 = arith.constant 0 : index
    %430 = vector.load %arg15[%c1_155, %c0_156, %c0_157] : memref<2x1x32xf32, #tpu.memory_space<vmem>>, vector<1x1x32xf32>
    %431 = vector.shape_cast %430 : vector<1x1x32xf32> to vector<1x32xf32>
    %cst_158 = arith.constant dense<0.000000e+00> : vector<16xf32>
    %432 = vector.multi_reduction <add>, %427, %cst_158 [1] : vector<16x32xf32> to vector<16xf32>
    %433 = vector.shape_cast %432 : vector<16xf32> to vector<16x1xf32>
    %cst_159 = arith.constant 3.200000e+01 : f32
    %434 = vector.broadcast %cst_159 : f32 to vector<16x1xf32>
    %435 = arith.divf %433, %434 : vector<16x1xf32>
    %436 = vector.broadcast %435 : vector<16x1xf32> to vector<16x32xf32>
    %437 = arith.subf %427, %436 : vector<16x32xf32>
    %438 = arith.mulf %437, %437 : vector<16x32xf32>
    %cst_160 = arith.constant dense<0.000000e+00> : vector<16xf32>
    %439 = vector.multi_reduction <add>, %438, %cst_160 [1] : vector<16x32xf32> to vector<16xf32>
    %440 = vector.shape_cast %439 : vector<16xf32> to vector<16x1xf32>
    %cst_161 = arith.constant 3.200000e+01 : f32
    %441 = vector.broadcast %cst_161 : f32 to vector<16x1xf32>
    %442 = arith.divf %440, %441 : vector<16x1xf32>
    %443 = vector.broadcast %435 : vector<16x1xf32> to vector<16x32xf32>
    %444 = arith.subf %427, %443 : vector<16x32xf32>
    %cst_162 = arith.constant 9.99999996E-13 : f32
    %445 = vector.broadcast %cst_162 : f32 to vector<16x1xf32>
    %446 = arith.addf %442, %445 : vector<16x1xf32>
    %447 = math.rsqrt %446 : vector<16x1xf32>
    %448 = vector.broadcast %447 : vector<16x1xf32> to vector<16x32xf32>
    %449 = arith.mulf %444, %448 : vector<16x32xf32>
    %450 = vector.broadcast %429 : vector<1x32xf32> to vector<16x32xf32>
    %451 = arith.mulf %449, %450 : vector<16x32xf32>
    %452 = vector.broadcast %431 : vector<1x32xf32> to vector<16x32xf32>
    %453 = arith.addf %451, %452 : vector<16x32xf32>
    %454 = vector.shape_cast %453 : vector<16x32xf32> to vector<2x8x32xf32>
    %455 = vector.extract_strided_slice %454 {offsets = [0, 0, 0], sizes = [2, 1, 32], strides = [1, 1, 1]} : vector<2x8x32xf32> to vector<2x1x32xf32>
    %456 = vector.shape_cast %455 : vector<2x1x32xf32> to vector<2x32xf32>
    %457 = arith.truncf %456 : vector<2x32xf32> to vector<2x32xbf16>
    %c0_163 = arith.constant 0 : index
    %c0_164 = arith.constant 0 : index
    %458 = vector.load %arg16[%c0_163, %c0_164] : memref<32x32xbf16, #tpu.memory_space<vmem>>, vector<32x32xbf16>
    %cst_165 = arith.constant dense<0.000000e+00> : vector<2x32xf32>
    %459 = tpu.matmul %457, %458, %cst_165 {dimension_numbers = #tpu.dot_dimension_numbers<[1], [0], [0], [1], [0, 0, 1, 1], [], []>} : vector<2x32xbf16>, vector<32x32xbf16>, vector<2x32xf32> -> vector<2x32xf32>
    %c0_166 = arith.constant 0 : index
    %c0_167 = arith.constant 0 : index
    %460 = vector.load %arg17[%c0_166, %c0_167] : memref<1x32xf32, #tpu.memory_space<vmem>>, vector<1x32xf32>
    %461 = vector.broadcast %460 : vector<1x32xf32> to vector<2x32xf32>
    %462 = arith.addf %459, %461 : vector<2x32xf32>
    %463 = math.tanh %462 : vector<2x32xf32>
    %464 = arith.truncf %463 : vector<2x32xf32> to vector<2x32xbf16>
    %c0_168 = arith.constant 0 : index
    %c0_169 = arith.constant 0 : index
    %465 = vector.load %arg18[%c0_168, %c0_169] : memref<32x128xbf16, #tpu.memory_space<vmem>>, vector<32x128xbf16>
    %cst_170 = arith.constant dense<0.000000e+00> : vector<2x128xf32>
    %466 = tpu.matmul %464, %465, %cst_170 {dimension_numbers = #tpu.dot_dimension_numbers<[1], [0], [0], [1], [0, 0, 1, 1], [], []>} : vector<2x32xbf16>, vector<32x128xbf16>, vector<2x128xf32> -> vector<2x128xf32>
    %c0_171 = arith.constant 0 : index
    %c0_172 = arith.constant 0 : index
    %467 = vector.load %arg19[%c0_171, %c0_172] : memref<1x128xf32, #tpu.memory_space<vmem>>, vector<1x128xf32>
    %468 = vector.broadcast %467 : vector<1x128xf32> to vector<2x128xf32>
    %469 = arith.addf %466, %468 : vector<2x128xf32>
    %c0_173 = arith.constant 0 : index
    %c0_174 = arith.constant 0 : index
    %470 = vector.load %arg20[%c0_173, %c0_174] : memref<2x128xf32, #tpu.memory_space<vmem>>, vector<2x128xf32>
    tpu.vector_store %arg20[%c0_173, %c0_174], %469 {strides = array<i32>} : memref<2x128xf32, #tpu.memory_space<vmem>>, vector<2x128xf32>,
    return
  }
}

</mosaic_0001>

<bundles_post_ra>
// kernel: ans_encoder_forward.1
= control target key start
LH: loop header
LB: loop body
LE: loop exit
PB: predicated region body
PF: predicated region fallthrough
CT: control target
= control target key end

     0   :  { %s4769_s0 = inlined_call_operand.vmem [shape: f32[2,8,32], index: 0, kind: input, shape index: {}]   ;;  %s4770_s1 = inlined_call_operand.vmem [shape: f32[2,8], index: 1, kind: input, shape index: {}]   ;;  %s4771_s2 = inlined_call_operand.vmem [shape: f32[1,32], index: 2, kind: input, shape index: {}]   ;;  %s4772_s3 = inlined_call_operand.vmem [shape: f32[1,32], index: 3, kind: input, shape index: {}]   ;;  %s4773_s4 = inlined_call_operand.vmem [shape: bf16[2,32,96], index: 4, kind: input, shape index: {}]   ;;  %s4774_s5 = inlined_call_operand.vmem [shape: f32[2,1,96], index: 5, kind: input, shape index: {}]   ;;  %s4775_s6 = inlined_call_operand.vmem [shape: bf16[2,32,32], index: 6, kind: input, shape index: {}]   ;;  %s4776_s7 = inlined_call_operand.vmem [shape: f32[2,1,32], index: 7, kind: input, shape index: {}]   ;;  %s4777_s8 = inlined_call_operand.vmem [shape: f32[2,1,32], index: 8, kind: input, shape index: {}]   ;;  %s4778_s9 = inlined_call_operand.vmem [shape: f32[2,1,32], index: 9, kind: input, shape index: {}]   ;;  %s4779_s10 = inlined_call_operand.vmem [shape: bf16[2,32,128], index: 10, kind: input, shape index: {}]   ;;  %s4780_s11 = inlined_call_operand.vmem [shape: f32[2,1,128], index: 11, kind: input, shape index: {}]   ;;  %s4781_s12 = inlined_call_operand.vmem [shape: bf16[2,128,32], index: 12, kind: input, shape index: {}]   ;;  %s4782_s13 = inlined_call_operand.vmem [shape: f32[2,1,32], index: 13, kind: input, shape index: {}]   ;;  %s4783_s14 = inlined_call_operand.vmem [shape: f32[2,1,32], index: 14, kind: input, shape index: {}]   ;;  %s4784_s15 = inlined_call_operand.vmem [shape: f32[2,1,32], index: 15, kind: input, shape index: {}]   ;;  %s4785_s16 = inlined_call_operand.vmem [shape: bf16[32,32], index: 16, kind: input, shape index: {}]   ;;  %s4786_s17 = inlined_call_operand.vmem [shape: f32[1,32], index: 17, kind: input, shape index: {}]   ;;  %s4787_s18 = inlined_call_operand.vmem [shape: bf16[32,128], index: 18, kind: input, shape index: {}]   ;;  %s4788_s19 = inlined_call_operand.vmem [shape: f32[1,128], index: 19, kind: input, shape index: {}]   ;;  %s4789_s20 = inlined_call_operand.hbm [shape: f32[2,128], index: 20, kind: output, shape index: {}]  }
   0x1   :  { %4802 = sst [smem:[#allocation5_spill]] %s4769_s0 }
   0x2   :  { %4803 = sst [smem:[#allocation6_spill]] %s4770_s1 }
   0x3   :  { %4804 = sst [smem:[#allocation7_spill]] %s4771_s2 }
   0x4   :  { %4805 = sst [smem:[#allocation8_spill]] %s4772_s3 }
   0x5   :  { %4806 = sst [smem:[#allocation9_spill]] %s4773_s4 }
   0x6   :  { %s4807_s23 = sld [smem:[#allocation5_spill]]  ;;  %vm71_vm0 = vcmask 261120  }
   0xc   :  { %v67_v0 = vld [vmem:[%s4807_s23] sm:$0xff]  ;;  %v68_v1 = vld [vmem:[%s4807_s23 + $0x8] sm:$0xff] }
   0xd   :  { %v72_v2 = vsel %vm71_vm0, %v67_v0, 0.0  ;;  %v75_v3 = vsel %vm71_vm0, %v68_v1, 0.0 }
   0xe   :  { %73 = vadd.xlane.f32.xlu0 %v72_v2 }
  0x12   :  { %76 = vadd.xlane.f32.xlu0 %v75_v3 }
  0x13   :  { %25 = vsyncpa [#allocation3], 0  ;;  %s4808_s26 = sld [smem:[#allocation9_spill]]  ;;  %v3968_v15 = vmov 0.0   ;;  %vm3969_vm1 = vmmov 0   ;;  %s4809_s30 = sld [smem:[#allocation7_spill]]  ;;  %v122_v53 = vlaneseq }
  0x14   :  { %3479 = vmatprep.subr.bf16.mxu1 %v3968_v15  ;;  %3493 = vmatprep.subr.bf16.mxu0 %v3968_v15  ;;  %s4810_s1 = sld [smem:[#allocation8_spill]]  ;;  %v3235_v34 = vld [vmem:[%s4774_s5] ss:$0 sm:$0xff]  ;;  %s3970_s24 = smov 96   ;;  %vm232_vm2 = vcmask 64512   ;;  %vm357_vm3 = vcmask 1043456  }
  0x15   :  { %3483 = vmatprep.mubr.msk.bf16.mxu1 %vm3969_vm1, %v3968_v15  ;;  %3495 = vmatprep.mubr.msk.bf16.mxu0 %vm3969_vm1, %v3968_v15  ;;  %v3971_v51 = vmov 1966171168   ;;  %s4811_s3 = sld [smem:[#allocation6_spill]]  ;;  %v123_v57 = vshrl.u32 %v122_v53, 7  ;;  %s3972_s27 = smov 64   ;;  %vm3091_vm4 = vcmask 1041409  }
  0x16   :  { %v120_v52 = vunpack.c.l.s4 %v3971_v51  ;;  %s3973_s28 = smov 88   ;;  %s3974_s4 = smov 120  }
  0x17   :  { %v221_v63 = vsub.s32 0, %v123_v57  ;;  %s3975_s29 = smov 56   ;;  %s4800_s0 = smov 112  }
  0x18   :  { %v121_v56 = vunpack.c.0.s8 %v120_v52  ;;  %s4798_s2 = smov 48   ;;  %s4796_s25 = smov 72  }
  0x19   :  { %v3822_v14 = vld [vmem:[%s4808_s26] sm:$0xff]   ;;  %v3823_v16 = vld [vmem:[%s4808_s26 + $0x8] sm:$0xff]   ;;  %s4792_s22 = smov 40   ;;  %s4816_s21 = smov 40  }
  0x1a   :  { %3480 = vmatpush3.bf16.msra.mxu1 %v3822_v14  ;;  %v3232_v25 = vld [vmem:[%s4809_s30] ss:$0 sm:$0xff]  ;;  %v124_v59 = vsub.s32 %v121_v56, %v123_v57  ;;  %s3976_s30 = smov 80  }
  0x1b   :  { %3481 = vmatprep.subr.bf16.mxu1 %v3968_v15  ;;  %v3233_v29 = vld [vmem:[%s4810_s1] ss:$0 sm:$0xff] }
  0x1c   :  { %v115_v54 = vld [vmem:[%s4811_s3] sm:$0x3]  ;;  %s4794_s3 = smov 104  }
  0x1d   :  { %v3234_v55 = vadd.f32 -1.0, %v115_v54 }
  0x1e   :  { %3482 = vmatpush3.bf16.msra.mxu1 %v3823_v16 }
  0x1f   :  { %3487 = vmatprep.subr.bf16.mxu1 %v3968_v15  ;;  %v117_v58 = vmul.f32 1e+09, %v3234_v55 }
  0x21   :  { %v125_v60 = vrot.slane %v117_v58, %v124_v59 }
  0x23   :  { %v126_v61 = vcombine.high %v125_v60, %v125_v60  ;;  %v133_v62 = vrot.slane %v125_v60, %v124_v59 }
  0x9b   :  { %v74_v4 = vpop.xlane.xlu0 %73 }
  0x9c   :  { %v79_v5 = vmul.f32 0.03125, %v74_v4 }
  0x9e   :  { %v81_v6 = vsub.f32 %v67_v0, %v79_v5  ;;  %v140_v0 = vrot.slane %v126_v61, %v124_v59 }
  0x9f   :  { %v77_v7 = vpop.xlane.xlu0 %76 }
  0xa0   :  { %v80_v8 = vmul.f32 0.03125, %v77_v7  ;;  %v83_v9 = vmul.f32 %v81_v6, %v81_v6  ;;  %v4159_v2 = vrot.slane %v140_v0, %v221_v63 }
  0xa2   :  { %v82_v10 = vsub.f32 %v68_v1, %v80_v8  ;;  %v85_v11 = vsel %vm71_vm0, %v83_v9, 0.0  ;;  %v4157_v1 = vrot.slane %v133_v62, %v221_v63 }
  0xa3   :  { %86 = vadd.xlane.f32.xlu1 %v85_v11 }
  0xa4   :  { %v84_v12 = vmul.f32 %v82_v10, %v82_v10 }
  0xa6   :  { %v88_v13 = vsel %vm71_vm0, %v84_v12, 0.0 }
  0xa7   :  { %89 = vadd.xlane.f32.xlu1 %v88_v13 }
 0x130   :  { %v87_v17 = vpop.xlane.xlu1 %86 }
 0x131   :  { %v91_v18 = vmul.f32 0.03125, %v87_v17 }
 0x133   :  { %v93_v19 = vadd.f32 1e-12, %v91_v18 }
 0x134   :  { %v90_v20 = vpop.xlane.xlu1 %89 }
 0x135   :  { %3850 = vrsqrt.f32 %v93_v19  ;;  %v92_v21 = vmul.f32 0.03125, %v90_v20 }
 0x137   :  { %v94_v22 = vadd.f32 1e-12, %v92_v21 }
 0x139   :  { %3852 = vrsqrt.f32 %v94_v22 }
 0x13f   :  { %v3851_v23 = vpop.eup %3850 }
 0x140   :  { %v97_v24 = vmul.f32 %v3851_v23, %v81_v6 }
 0x142   :  { %v105_v28 = vmul.f32 %v3232_v25, %v97_v24 }
 0x143   :  { %v3853_v26 = vpop.eup %3852 }
 0x144   :  { %v98_v27 = vmul.f32 %v3853_v26, %v82_v10  ;;  %v4118_v31 = vadd.f32 %v3233_v29, %v105_v28 }
 0x146   :  { %v106_v30 = vmul.f32 %v3232_v25, %v98_v27 }
 0x148   :  { %v4120_v32 = vadd.f32 %v3233_v29, %v106_v30 }
 0x14a   :  { %v149_v33 = vpack.c.bf16 %v4120_v32, %v4118_v31 }
 0x14c   :  { %3484 = vmatmul.mubr.msk.bf16.vlgmr.msra.gmra.mrb[0].mxu1 %vm71_vm0, %v149_v33 }
 0x14d   :  { %3489 = vmatprep.mubr.msk.bf16.mxu1 %vm3969_vm1, %v3968_v15 }
 0x21f   :  { %v206_v35 = vpop.f32.mrb[0].mxu1 }
 0x220   :  { %v207_v36 = vadd.f32 %v3235_v34, %v206_v35  ;;  %v3485_v37 = vpop.f32.mrb[1].mxu1 }
 0x221   :  { %v209_v38 = vpop.f32.mrb[2].mxu1 }
 0x222   :  { %v4130_v39 = vpack.c.bf16 %v207_v36, %v207_v36  ;;  %v210_v40 = vadd.f32 %v3235_v34, %v209_v38  ;;  %v3486_v41 = vpop.f32.mrb[3].mxu1  ;;  %v213_v46 = vmul.f32 0.35355338, %v207_v36 }
 0x224   :  { %v4132_v42 = vpack.c.bf16 %v210_v40, %v210_v40  ;;  %230 = vrot.lane.b32.xlu0 %v4130_v39, %s3970_s24  ;;  %v214_v48 = vmul.f32 0.35355338, %v210_v40  ;;  %v4142_v49 = vpack.c.bf16 %v213_v46, %v213_v46 }
 0x226   :  { %280 = vrot.lane.b32.xlu1 %v4132_v42, %s3970_s24  ;;  %v4144_v50 = vpack.c.bf16 %v214_v48, %v214_v48 }
 0x296   :  { %v231_v43 = vpop.permute.xlu0 %230 }
 0x297   :  { %v237_v44 = vsel %vm232_vm2, %v231_v43, 0 }
 0x298   :  { %3488 = vmatpush3.bf16.xpose.msra.mxu1 %v237_v44  ;;  %v281_v45 = vpop.permute.xlu1 %280 }
 0x299   :  { %v286_v47 = vsel %vm232_vm2, %v281_v45, 0  ;;  %3499 = vmatprep.subr.bf16.mxu1 %v3968_v15 }
 0x29a   :  { %3494 = vmatpush3.bf16.xpose.msra.mxu0 %v286_v47 }
 0x29b   :  { %3505 = vmatprep.subr.bf16.mxu0 %v3968_v15 }
 0x29f   :  { %3490 = vmatmul.mubr.msk.bf16.vlgmr.msra.gmra.mrb[4].mxu1 %vm232_vm2, %v4142_v49 }
 0x2a0   :  { %3501 = vmatprep.mubr.msk.bf16.mxu1 %vm3969_vm1, %v3968_v15 }
 0x2a1   :  { %3496 = vmatmul.mubr.msk.bf16.vlgmr.msra.gmra.mrb[0].mxu0 %vm232_vm2, %v4144_v50 }
 0x2a2   :  { %3507 = vmatprep.mubr.msk.bf16.mxu0 %vm3969_vm1, %v3968_v15 }
 0x372   :  { %v273_v3 = vpop.f32.mrb[4].mxu1 }
 0x373   :  { %v274_v4 = vadd.f32 %v273_v3, %v4157_v1  ;;  %v3491_v5 = vpop.f32.mrb[5].mxu1 }
 0x374   :  { %v276_v6 = vpop.f32.mrb[6].mxu1  ;;  %v322_v7 = vpop.f32.mrb[0].mxu0 }
 0x375   :  { %v323_v8 = vadd.f32 %v322_v7, %v4159_v2  ;;  %v3492_v9 = vpop.f32.mrb[7].mxu1  ;;  %v3497_v10 = vpop.f32.mrb[1].mxu0  ;;  %v328_v11 = vsel %vm232_vm2, %v274_v4, -inf }
 0x376   :  { %v325_v12 = vpop.f32.mrb[2].mxu0  ;;  %329 = vmax.xlane.f32.xlu1 %v328_v11 }
 0x377   :  { %v3498_v13 = vpop.f32.mrb[3].mxu0  ;;  %v331_v14 = vsel %vm232_vm2, %v323_v8, -inf }
 0x378   :  { %332 = vmax.xlane.f32.xlu0 %v331_v14 }
 0x387   :  { %401 = vrot.lane.b32.xlu1 %v4132_v42, %s3972_s27 }
 0x38b   :  { %453 = vrot.lane.b32.xlu1 %v4130_v39, %s3973_s28 }
 0x403   :  { %v330_v16 = vpop.xlane.xlu1 %329 }
 0x404   :  { %v334_v17 = vsub.f32 %v274_v4, %v330_v16 }
 0x405   :  { %v333_v18 = vpop.xlane.xlu0 %332 }
 0x406   :  { %v336_v19 = vmul.f32 1.442695, %v334_v17  ;;  %v335_v20 = vsub.f32 %v323_v8, %v333_v18 }
 0x407   :  { %v402_v21 = vpop.permute.xlu1 %401 }
 0x408   :  { %3854 = vpow2.f32 %v336_v19  ;;  %v338_v22 = vmul.f32 1.442695, %v335_v20  ;;  %v407_v23 = vsel %vm357_vm3, %v402_v21, 0 }
 0x409   :  { %3506 = vmatpush3.bf16.msra.mxu0 %v407_v23 }
 0x40a   :  { %3856 = vpow2.f32 %v338_v22  ;;  %3517 = vmatprep.subr.bf16.mxu0 %v3968_v15 }
 0x40b   :  { %v454_v28 = vpop.permute.xlu1 %453 }
 0x40c   :  { %v459_v43 = vsel %vm232_vm2, %v454_v28, 0 }
 0x412   :  { %v3855_v24 = vpop.eup %3854 }
 0x413   :  { %v340_v25 = vsel %vm232_vm2, %v3855_v24, 0.0 }
 0x414   :  { %v3857_v26 = vpop.eup %3856  ;;  %341 = vadd.xlane.f32.xlu0 %v340_v25 }
 0x415   :  { %v343_v27 = vsel %vm232_vm2, %v3857_v26, 0.0 }
 0x416   :  { %344 = vadd.xlane.f32.xlu1 %v343_v27  ;;  %v146_v27 = vld [vmem:[%s4775_s6 + $0x4] sm:$0xf] }
 0x427   :  { %504 = vrot.lane.b32.xlu1 %v4132_v42, %s3973_s28 }
 0x42a   :  { %352 = vrot.lane.b32.xlu0 %v4130_v39, %s3972_s27 }
 0x42b   :  { %502 = vrot.lane.b32.xlu1 %v4144_v50, %s3974_s4 }
 0x42e   :  { %451 = vrot.lane.b32.xlu0 %v4142_v49, %s3974_s4 }
 0x4a1   :  { %v342_v29 = vpop.xlane.xlu0 %341 }
 0x4a2   :  { %3858 = vrcp.f32 %v342_v29 }
 0x4a3   :  { %v345_v30 = vpop.xlane.xlu1 %344 }
 0x4a4   :  { %3860 = vrcp.f32 %v345_v30  ;;  %v677_v30 = vsel %vm357_vm3, %v146_v27, 0 }
 0x4a5   :  { %v353_v33 = vpop.permute.xlu0 %352 }
 0x4a6   :  { %v359_v34 = vsel %vm357_vm3, %v353_v33, 0 }
 0x4a7   :  { %3500 = vmatpush3.bf16.msra.mxu1 %v359_v34  ;;  %v505_v41 = vpop.permute.xlu1 %504  ;;  %v145_v34 = vld [vmem:[%s4775_s6] sm:$0xf] }
 0x4a8   :  { %3511 = vmatprep.subr.bf16.mxu1 %v3968_v15  ;;  %v510_v45 = vsel %vm232_vm2, %v505_v41, 0 }
 0x4a9   :  { %v452_v46 = vpop.permute.xlu0 %451 }
 0x4ab   :  { %v503_v47 = vpop.permute.xlu1 %502 }
 0x4ac   :  { %v3859_v35 = vpop.eup %3858 }
 0x4ad   :  { %v348_v36 = vmul.f32 %v3859_v35, %v3855_v24 }
 0x4ae   :  { %v3861_v37 = vpop.eup %3860 }
 0x4af   :  { %v349_v38 = vmul.f32 %v3861_v37, %v3857_v26  ;;  %v350_v40 = vpack.c.bf16 %v348_v36, %v348_v36  ;;  %v724_v37 = vsel %vm357_vm3, %v145_v34, 0 }
 0x4b1   :  { %3502 = vmatmul.mubr.msk.bf16.vlgmr.msra.gmra.mrb[8].mxu1 %vm232_vm2, %v350_v40  ;;  %v351_v44 = vpack.c.bf16 %v349_v38, %v349_v38 }
 0x4b2   :  { %3512 = vmatpush3.bf16.xpose.msra.mxu1 %v459_v43  ;;  %3513 = vmatprep.mubr.msk.bf16.mxu1 %vm3969_vm1, %v3968_v15 }
 0x4b3   :  { %3508 = vmatmul.mubr.msk.bf16.vlgmr.msra.gmra.mrb[4].mxu0 %vm232_vm2, %v351_v44  ;;  %3523 = vmatprep.subr.bf16.mxu1 %v3968_v15 }
 0x4b4   :  { %3518 = vmatpush3.bf16.xpose.msra.mxu0 %v510_v45  ;;  %3519 = vmatprep.mubr.msk.bf16.mxu0 %vm3969_vm1, %v3968_v15 }
 0x4b5   :  { %3529 = vmatprep.subr.bf16.mxu0 %v3968_v15 }
 0x4b9   :  { %3514 = vmatmul.mubr.msk.bf16.vlgmr.msra.gmra.mrb[12].mxu1 %vm232_vm2, %v452_v46 }
 0x4ba   :  { %3525 = vmatprep.mubr.msk.bf16.mxu1 %vm3969_vm1, %v3968_v15 }
 0x4bb   :  { %3520 = vmatmul.mubr.msk.bf16.vlgmr.msra.gmra.mrb[8].mxu0 %vm232_vm2, %v503_v47 }
 0x4bc   :  { %3531 = vmatprep.mubr.msk.bf16.mxu0 %vm3969_vm1, %v3968_v15 }
 0x584   :  { %v4199_v48 = vpop.f32.mrb[8].mxu1 }
 0x585   :  { %v3503_v51 = vpop.f32.mrb[9].mxu1 }
 0x586   :  { %v398_v52 = vpop.f32.mrb[10].mxu1  ;;  %v4201_v53 = vpop.f32.mrb[4].mxu0 }
 0x587   :  { %v449_v54 = vpack.c.bf16 %v4201_v53, %v4199_v48  ;;  %v3504_v55 = vpop.f32.mrb[11].mxu1  ;;  %v3509_v56 = vpop.f32.mrb[5].mxu0 }
 0x588   :  { %v446_v57 = vpop.f32.mrb[6].mxu0 }
 0x589   :  { %v3510_v58 = vpop.f32.mrb[7].mxu0 }
 0x58c   :  { %v495_v59 = vpop.f32.mrb[12].mxu1 }
 0x58d   :  { %v496_v60 = vadd.f32 %v495_v59, %v4157_v1  ;;  %v3515_v61 = vpop.f32.mrb[13].mxu1 }
 0x58e   :  { %v498_v62 = vpop.f32.mrb[14].mxu1  ;;  %v546_v63 = vpop.f32.mrb[8].mxu0 }
 0x58f   :  { %v547_v0 = vadd.f32 %v546_v63, %v4159_v2  ;;  %v3516_v3 = vpop.f32.mrb[15].mxu1  ;;  %v3521_v4 = vpop.f32.mrb[9].mxu0  ;;  %v552_v5 = vsel %vm232_vm2, %v496_v60, -inf }
 0x590   :  { %v549_v6 = vpop.f32.mrb[10].mxu0  ;;  %553 = vmax.xlane.f32.xlu0 %v552_v5 }
 0x591   :  { %v3522_v7 = vpop.f32.mrb[11].mxu0  ;;  %v555_v8 = vsel %vm232_vm2, %v547_v0, -inf }
 0x592   :  { %556 = vmax.xlane.f32.xlu1 %v555_v8 }
 0x5a3   :  { %624 = vrot.lane.b32.xlu1 %v4132_v42, %s3975_s29 }
 0x5a7   :  { %769 = vrot.lane.b32.xlu1 %v4130_v39, %s3976_s30 }
 0x5ab   :  { %819 = vrot.lane.b32.xlu1 %v4132_v42, %s3976_s30 }
 0x5af   :  { %817 = vrot.lane.b32.xlu1 %v4144_v50, %s4800_s0 }
 0x61d   :  { %v554_v9 = vpop.xlane.xlu0 %553 }
 0x61e   :  { %v558_v10 = vsub.f32 %v496_v60, %v554_v9 }
 0x61f   :  { %v557_v11 = vpop.xlane.xlu1 %556 }
 0x620   :  { %v560_v12 = vmul.f32 1.442695, %v558_v10  ;;  %v559_v13 = vsub.f32 %v547_v0, %v557_v11 }
 0x622   :  { %3862 = vpow2.f32 %v560_v12  ;;  %v562_v14 = vmul.f32 1.442695, %v559_v13 }
 0x623   :  { %v625_v16 = vpop.permute.xlu1 %624 }
 0x624   :  { %3864 = vpow2.f32 %v562_v14  ;;  %v630_v17 = vsel %vm357_vm3, %v625_v16, 0 }
 0x625   :  { %3530 = vmatpush3.bf16.msra.mxu0 %v630_v17 }
 0x626   :  { %3541 = vmatprep.subr.bf16.mxu0 %v3968_v15 }
 0x627   :  { %v770_v38 = vpop.permute.xlu1 %769 }
 0x62b   :  { %v820_v40 = vpop.permute.xlu1 %819 }
 0x62c   :  { %v3863_v18 = vpop.eup %3862  ;;  %v825_v41 = vsel %vm232_vm2, %v820_v40, 0 }
 0x62d   :  { %v564_v19 = vsel %vm232_vm2, %v3863_v18, 0.0 }
 0x62e   :  { %v3865_v20 = vpop.eup %3864  ;;  %565 = vadd.xlane.f32.xlu0 %v564_v19 }
 0x62f   :  { %v567_v21 = vsel %vm232_vm2, %v3865_v20, 0.0  ;;  %v818_v43 = vpop.permute.xlu1 %817 }
 0x632   :  { %568 = vadd.xlane.f32.xlu0 %v567_v21 }
 0x648   :  { %576 = vrot.lane.b32.xlu0 %v4130_v39, %s3975_s29 }
 0x64c   :  { %767 = vrot.lane.b32.xlu0 %v4142_v49, %s4800_s0 }
 0x6bb   :  { %v566_v22 = vpop.xlane.xlu0 %565 }
 0x6bc   :  { %3866 = vrcp.f32 %v566_v22 }
 0x6bf   :  { %v569_v23 = vpop.xlane.xlu0 %568 }
 0x6c0   :  { %3868 = vrcp.f32 %v569_v23 }
 0x6c3   :  { %v577_v24 = vpop.permute.xlu0 %576 }
 0x6c4   :  { %v582_v25 = vsel %vm357_vm3, %v577_v24, 0 }
 0x6c5   :  { %3524 = vmatpush3.bf16.msra.mxu1 %v582_v25 }
 0x6c6   :  { %v3867_v26 = vpop.eup %3866  ;;  %3535 = vmatprep.subr.bf16.mxu1 %v3968_v15 }
 0x6c7   :  { %v572_v28 = vmul.f32 %v3867_v26, %v3863_v18  ;;  %v768_v58 = vpop.permute.xlu0 %767 }
 0x6c9   :  { %v574_v29 = vpack.c.bf16 %v572_v28, %v572_v28 }
 0x6ca   :  { %v3869_v33 = vpop.eup %3868 }
 0x6cb   :  { %v573_v35 = vmul.f32 %v3869_v33, %v3865_v20  ;;  %3526 = vmatmul.mubr.msk.bf16.vlgmr.msra.gmra.mrb[16].mxu1 %vm232_vm2, %v574_v29 }
 0x6cc   :  { %3536 = vmatpush3.bf16.msra.mxu1 %v677_v30  ;;  %3537 = vmatprep.mubr.msk.bf16.mxu1 %vm3969_vm1, %v3968_v15 }
 0x6cd   :  { %v575_v36 = vpack.c.bf16 %v573_v35, %v573_v35  ;;  %3547 = vmatprep.subr.bf16.mxu1 %v3968_v15 }
 0x6cf   :  { %3532 = vmatmul.mubr.msk.bf16.vlgmr.msra.gmra.mrb[12].mxu0 %vm232_vm2, %v575_v36 }
 0x6d0   :  { %3542 = vmatpush3.bf16.msra.mxu0 %v724_v37  ;;  %3543 = vmatprep.mubr.msk.bf16.mxu0 %vm3969_vm1, %v3968_v15 }
 0x6d1   :  { %3553 = vmatprep.subr.bf16.mxu0 %v3968_v15 }
 0x6d7   :  { %3544 = vmatmul.mubr.msk.bf16.vlgmr.msra.gmra.mrb[16].mxu0 %vm232_vm2, %v449_v54  ;;  %v775_v54 = vsel %vm232_vm2, %v770_v38, 0 }
 0x6d8   :  { %3555 = vmatprep.mubr.msk.bf16.mxu0 %vm3969_vm1, %v3968_v15 }
 0x6d9   :  { %3554 = vmatpush3.bf16.xpose.msra.mxu0 %v825_v41 }
 0x6da   :  { %3565 = vmatprep.subr.bf16.mxu0 %v3968_v15 }
 0x6e0   :  { %3556 = vmatmul.mubr.msk.bf16.vlgmr.msra.gmra.mrb[20].mxu0 %vm232_vm2, %v818_v43 }
 0x6e1   :  { %3567 = vmatprep.mubr.msk.bf16.mxu0 %vm3969_vm1, %v3968_v15 }
 0x79e   :  { %v618_v44 = vpop.f32.mrb[16].mxu1 }
 0x79f   :  { %v3527_v45 = vpop.f32.mrb[17].mxu1 }
 0x7a0   :  { %v621_v46 = vpop.f32.mrb[18].mxu1 }
 0x7a1   :  { %v3528_v47 = vpop.f32.mrb[19].mxu1 }
 0x7a2   :  { %v666_v48 = vpop.f32.mrb[12].mxu0 }
 0x7a3   :  { %v672_v51 = vpack.c.bf16 %v666_v48, %v618_v44  ;;  %v3533_v52 = vpop.f32.mrb[13].mxu0 }
 0x7a4   :  { %v669_v53 = vpop.f32.mrb[14].mxu0 }
 0x7a5   :  { %v3534_v55 = vpop.f32.mrb[15].mxu0  ;;  %3538 = vmatmul.mubr.msk.bf16.vlgmr.msra.gmra.mrb[20].mxu1 %vm232_vm2, %v672_v51  ;;  %v147_v51 = vld [vmem:[%s4775_s6 + $0x8] sm:$0xf] }
 0x7a6   :  { %3548 = vmatpush3.bf16.xpose.msra.mxu1 %v775_v54  ;;  %3549 = vmatprep.mubr.msk.bf16.mxu1 %vm3969_vm1, %v3968_v15  ;;  %v992_v52 = vsel %vm357_vm3, %v147_v51, 0 }
 0x7a7   :  { %3559 = vmatprep.subr.bf16.mxu1 %v3968_v15 }
 0x7aa   :  { %v760_v56 = vpop.f32.mrb[16].mxu0 }
 0x7ab   :  { %v3545_v57 = vpop.f32.mrb[17].mxu0 }
 0x7ac   :  { %v763_v59 = vpop.f32.mrb[18].mxu0 }
 0x7ad   :  { %v3546_v60 = vpop.f32.mrb[19].mxu0  ;;  %3550 = vmatmul.mubr.msk.bf16.vlgmr.msra.gmra.mrb[24].mxu1 %vm232_vm2, %v768_v58 }
 0x7ae   :  { %3561 = vmatprep.mubr.msk.bf16.mxu1 %vm3969_vm1, %v3968_v15 }
 0x7b3   :  { %v861_v61 = vpop.f32.mrb[20].mxu0 }
 0x7b4   :  { %v862_v62 = vadd.f32 %v861_v61, %v4159_v2  ;;  %v3557_v63 = vpop.f32.mrb[21].mxu0 }
 0x7b5   :  { %v864_v0 = vpop.f32.mrb[22].mxu0 }
 0x7b6   :  { %v3558_v3 = vpop.f32.mrb[23].mxu0  ;;  %v870_v4 = vsel %vm232_vm2, %v862_v62, -inf }
 0x7b7   :  { %871 = vmax.xlane.f32.xlu1 %v870_v4 }
 0x7c8   :  { %939 = vrot.lane.b32.xlu1 %v4132_v42, %s4798_s2 }
 0x7cc   :  { %1039 = vrot.lane.b32.xlu1 %v4130_v39, %s4796_s25 }
 0x7d0   :  { %1089 = vrot.lane.b32.xlu1 %v4132_v42, %s4796_s25 }
 0x7d4   :  { %1087 = vrot.lane.b32.xlu1 %v4144_v50, %s4794_s3 }
 0x844   :  { %v872_v5 = vpop.xlane.xlu1 %871 }
 0x845   :  { %v874_v8 = vsub.f32 %v862_v62, %v872_v5 }
 0x847   :  { %v877_v9 = vmul.f32 1.442695, %v874_v8 }
 0x848   :  { %v940_v6 = vpop.permute.xlu1 %939 }
 0x849   :  { %v945_v7 = vsel %vm357_vm3, %v940_v6, 0  ;;  %3870 = vpow2.f32 %v877_v9 }
 0x84a   :  { %3566 = vmatpush3.bf16.msra.mxu0 %v945_v7 }
 0x84b   :  { %3577 = vmatprep.subr.bf16.mxu0 %v3968_v15 }
 0x84c   :  { %v1040_v34 = vpop.permute.xlu1 %1039 }
 0x84d   :  { %v1045_v36 = vsel %vm232_vm2, %v1040_v34, 0 }
 0x853   :  { %v3871_v22 = vpop.eup %3870 }
 0x854   :  { %v882_v23 = vsel %vm232_vm2, %v3871_v22, 0.0 }
 0x878   :  { %v713_v10 = vpop.f32.mrb[20].mxu1 }
 0x879   :  { %v4274_v11 = vadd.f32 %v760_v56, %v713_v10  ;;  %v3539_v12 = vpop.f32.mrb[21].mxu1 }
 0x87a   :  { %v716_v13 = vpop.f32.mrb[22].mxu1 }
 0x87b   :  { %v4276_v14 = vadd.f32 %v763_v59, %v716_v13  ;;  %v3540_v16 = vpop.f32.mrb[23].mxu1  ;;  %v1090_v59 = vpop.permute.xlu1 %1089 }
 0x87c   :  { %v1095_v0 = vsel %vm232_vm2, %v1090_v59, 0 }
 0x87f   :  { %v1088_v4 = vpop.permute.xlu1 %1087 }
 0x880   :  { %v811_v17 = vpop.f32.mrb[24].mxu1 }
 0x881   :  { %v812_v50 = vadd.f32 %v811_v17, %v4157_v1  ;;  %v3551_v18 = vpop.f32.mrb[25].mxu1 }
 0x882   :  { %v814_v19 = vpop.f32.mrb[26].mxu1 }
 0x883   :  { %v3552_v20 = vpop.f32.mrb[27].mxu1  ;;  %v867_v21 = vsel %vm232_vm2, %v812_v50, -inf }
 0x884   :  { %868 = vmax.xlane.f32.xlu0 %v867_v21 }
 0x888   :  { %883 = vadd.xlane.f32.xlu0 %v882_v23 }
 0x911   :  { %v869_v24 = vpop.xlane.xlu0 %868 }
 0x912   :  { %v873_v25 = vsub.f32 %v812_v50, %v869_v24 }
 0x914   :  { %v875_v26 = vmul.f32 1.442695, %v873_v25 }
 0x915   :  { %v884_v27 = vpop.xlane.xlu0 %883 }
 0x916   :  { %3872 = vpow2.f32 %v875_v26 }
 0x917   :  { %3874 = vrcp.f32 %v884_v27 }
 0x920   :  { %v3873_v28 = vpop.eup %3872 }
 0x921   :  { %v3875_v29 = vpop.eup %3874  ;;  %v879_v30 = vsel %vm232_vm2, %v3873_v28, 0.0 }
 0x922   :  { %v888_v33 = vmul.f32 %v3875_v29, %v3871_v22  ;;  %880 = vadd.xlane.f32.xlu0 %v879_v30 }
 0x924   :  { %v890_v35 = vpack.c.bf16 %v888_v33, %v888_v33 }
 0x926   :  { %3568 = vmatmul.mubr.msk.bf16.vlgmr.msra.gmra.mrb[24].mxu0 %vm232_vm2, %v890_v35 }
 0x927   :  { %3578 = vmatpush3.bf16.xpose.msra.mxu0 %v1045_v36  ;;  %3579 = vmatprep.mubr.msk.bf16.mxu0 %vm3969_vm1, %v3968_v15 }
 0x928   :  { %3589 = vmatprep.subr.bf16.mxu0 %v3968_v15 }
 0x938   :  { %891 = vrot.lane.b32.xlu0 %v4130_v39, %s4798_s2 }
 0x93c   :  { %1037 = vrot.lane.b32.xlu0 %v4142_v49, %s4794_s3  ;;  %s4815_s3 = smov 104  }
 0x9af   :  { %v881_v37 = vpop.xlane.xlu0 %880 }
 0x9b0   :  { %3876 = vrcp.f32 %v881_v37 }
 0x9b3   :  { %v892_v38 = vpop.permute.xlu0 %891 }
 0x9b4   :  { %v897_v40 = vsel %vm357_vm3, %v892_v38, 0 }
 0x9b5   :  { %3560 = vmatpush3.bf16.msra.mxu1 %v897_v40  ;;  %v148_v40 = vld [vmem:[%s4775_s6 + $0xc] sm:$0xf] }
 0x9b6   :  { %3571 = vmatprep.subr.bf16.mxu1 %v3968_v15 }
 0x9b7   :  { %v1038_v41 = vpop.permute.xlu0 %1037 }
 0x9b8   :  { %3580 = vmatmul.mubr.msk.bf16.vlgmr.msra.gmra.mrb[28].mxu0 %vm232_vm2, %v1038_v41  ;;  %v1262_v41 = vsel %vm357_vm3, %v148_v40, 0  ;;  %v3262_v40 = vld [vmem:[%s4780_s11] ss:$0 sm:$0xff] }
 0x9b9   :  { %3591 = vmatprep.mubr.msk.bf16.mxu0 %vm3969_vm1, %v3968_v15 }
 0x9ba   :  { %v3877_v43 = vpop.eup %3876 }
 0x9bb   :  { %v887_v44 = vmul.f32 %v3877_v43, %v3873_v28 }
 0x9bd   :  { %v889_v45 = vpack.c.bf16 %v887_v44, %v887_v44 }
 0x9bf   :  { %3562 = vmatmul.mubr.msk.bf16.vlgmr.msra.gmra.mrb[28].mxu1 %vm232_vm2, %v889_v45 }
 0x9c0   :  { %3573 = vmatprep.mubr.msk.bf16.mxu1 %vm3969_vm1, %v3968_v15  ;;  %3572 = vmatpush3.bf16.msra.mxu1 %v992_v52 }
 0x9c1   :  { %3583 = vmatprep.subr.bf16.mxu1 %v3968_v15 }
 0x9f9   :  { %v981_v49 = vpop.f32.mrb[24].mxu0 }
 0x9fa   :  { %v3569_v46 = vpop.f32.mrb[25].mxu0 }
 0x9fb   :  { %v984_v47 = vpop.f32.mrb[26].mxu0 }
 0x9fc   :  { %v3570_v48 = vpop.f32.mrb[27].mxu0 }
 0xa8b   :  { %v1081_v53 = vpop.f32.mrb[28].mxu0 }
 0xa8c   :  { %v1082_v54 = vadd.f32 %v1081_v53, %v4157_v1  ;;  %v3581_v55 = vpop.f32.mrb[29].mxu0 }
 0xa8d   :  { %v1084_v56 = vpop.f32.mrb[30].mxu0 }
 0xa8e   :  { %v3582_v57 = vpop.f32.mrb[31].mxu0  ;;  %v1137_v58 = vsel %vm232_vm2, %v1082_v54, -inf }
 0xa8f   :  { %1138 = vmax.xlane.f32.xlu0 %v1137_v58 }
 0xa92   :  { %v933_v60 = vpop.f32.mrb[28].mxu1 }
 0xa93   :  { %v987_v61 = vpack.c.bf16 %v981_v49, %v933_v60  ;;  %v3563_v62 = vpop.f32.mrb[29].mxu1 }
 0xa94   :  { %v936_v63 = vpop.f32.mrb[30].mxu1 }
 0xa95   :  { %v3564_v3 = vpop.f32.mrb[31].mxu1  ;;  %3574 = vmatmul.mubr.msk.bf16.vlgmr.msra.gmra.mrb[32].mxu1 %vm232_vm2, %v987_v61 }
 0xa96   :  { %3584 = vmatpush3.bf16.xpose.msra.mxu1 %v1095_v0  ;;  %3585 = vmatprep.mubr.msk.bf16.mxu1 %vm3969_vm1, %v3968_v15 }
 0xa97   :  { %3595 = vmatprep.subr.bf16.mxu1 %v3968_v15 }
 0xa9d   :  { %3586 = vmatmul.mubr.msk.bf16.vlgmr.msra.gmra.mrb[36].mxu1 %vm232_vm2, %v1088_v4 }
 0xa9e   :  { %3597 = vmatprep.mubr.msk.bf16.mxu1 %vm3969_vm1, %v3968_v15 }
 0xb1c   :  { %v1139_v5 = vpop.xlane.xlu0 %1138 }
 0xb1d   :  { %v1143_v6 = vsub.f32 %v1082_v54, %v1139_v5  ;;  %v3259_v54 = vld [vmem:[%s4776_s7] ss:$0 sm:$0xff] }
 0xb1f   :  { %v1145_v7 = vmul.f32 1.442695, %v1143_v6 }
 0xb21   :  { %3878 = vpow2.f32 %v1145_v7 }
 0xb2b   :  { %v3879_v8 = vpop.eup %3878 }
 0xb2c   :  { %v1149_v9 = vsel %vm232_vm2, %v3879_v8, 0.0 }
 0xb2d   :  { %1150 = vadd.xlane.f32.xlu0 %v1149_v9 }
 0xb68   :  { %v1028_v10 = vpop.f32.mrb[32].mxu1 }
 0xb69   :  { %v1035_v12 = vadd.f32 %v1028_v10, %v4274_v11  ;;  %v3575_v13 = vpop.f32.mrb[33].mxu1 }
 0xb6a   :  { %v1031_v16 = vpop.f32.mrb[34].mxu1 }
 0xb6b   :  { %v1036_v17 = vadd.f32 %v1031_v16, %v4276_v14  ;;  %v3576_v50 = vpop.f32.mrb[35].mxu1  ;;  %v3825_v16 = vld [vmem:[%s4779_s10 + $0x8] sm:$0xff]  }
 0xb70   :  { %v1131_v18 = vpop.f32.mrb[36].mxu1 }
 0xb71   :  { %v1132_v19 = vadd.f32 %v1131_v18, %v4159_v2  ;;  %v3587_v20 = vpop.f32.mrb[37].mxu1 }
 0xb72   :  { %v1134_v21 = vpop.f32.mrb[38].mxu1 }
 0xb73   :  { %v3588_v22 = vpop.f32.mrb[39].mxu1  ;;  %v1140_v23 = vsel %vm232_vm2, %v1132_v19, -inf }
 0xb74   :  { %1141 = vmax.xlane.f32.xlu1 %v1140_v23  ;;  %v3260_v23 = vld [vmem:[%s4777_s8] ss:$0 sm:$0xff] }
 0xb85   :  { %1209 = vrot.lane.b32.xlu1 %v4132_v42, %s4792_s22 }
 0xbba   :  { %v1151_v29 = vpop.xlane.xlu0 %1150 }
 0xc01   :  { %v1142_v24 = vpop.xlane.xlu1 %1141 }
 0xc02   :  { %v1144_v11 = vsub.f32 %v1132_v19, %v1142_v24 }
 0xc04   :  { %v1147_v25 = vmul.f32 1.442695, %v1144_v11 }
 0xc05   :  { %v1210_v26 = vpop.permute.xlu1 %1209 }
 0xc06   :  { %3880 = vpow2.f32 %v1147_v25  ;;  %v1215_v14 = vsel %vm357_vm3, %v1210_v26, 0 }
 0xc07   :  { %3596 = vmatpush3.bf16.msra.mxu1 %v1215_v14  ;;  %3882 = vrcp.f32 %v1151_v29  ;;  %v3261_v14 = vld [vmem:[%s4778_s9] ss:$0 sm:$0xff] }
 0xc08   :  { %3607 = vmatprep.subr.bf16.mxu1 %v3968_v15 }
 0xc10   :  { %v3881_v27 = vpop.eup %3880 }
 0xc11   :  { %v1152_v28 = vsel %vm232_vm2, %v3881_v27, 0.0  ;;  %v3883_v42 = vpop.eup %3882 }
 0xc12   :  { %1153 = vadd.xlane.f32.xlu0 %v1152_v28  ;;  %v1157_v33 = vmul.f32 %v3883_v42, %v3879_v8 }
 0xc14   :  { %v1159_v36 = vpack.c.bf16 %v1157_v33, %v1157_v33  ;;  %v3827_v33 = vld [vmem:[%s4781_s12 + $0x8] sm:$0xff]  }
 0xc28   :  { %1161 = vrot.lane.b32.xlu0 %v4130_v39, %s4792_s22 }
 0xc9f   :  { %v1154_v30 = vpop.xlane.xlu0 %1153 }
 0xca0   :  { %3884 = vrcp.f32 %v1154_v30  ;;  %v3826_v30 = vld [vmem:[%s4781_s12] sm:$0xff]  }
 0xca3   :  { %v1162_v34 = vpop.permute.xlu0 %1161 }
 0xca4   :  { %v1167_v35 = vsel %vm357_vm3, %v1162_v34, 0  ;;  %v3828_v34 = vld [vmem:[%s4781_s12 + $0x10] sm:$0xff]  }
 0xca5   :  { %3590 = vmatpush3.bf16.msra.mxu0 %v1167_v35  ;;  %v3829_v35 = vld [vmem:[%s4781_s12 + $0x18] sm:$0xff]  }
 0xca6   :  { %3601 = vmatprep.subr.bf16.mxu0 %v3968_v15 }
 0xca8   :  { %3592 = vmatmul.mubr.msk.bf16.vlgmr.msra.gmra.mrb[32].mxu0 %vm232_vm2, %v1159_v36  ;;  %v3830_v36 = vld [vmem:[%s4781_s12 + $0x20] sm:$0xff]  }
 0xca9   :  { %3603 = vmatprep.mubr.msk.bf16.mxu0 %vm3969_vm1, %v3968_v15  ;;  %3602 = vmatpush3.bf16.msra.mxu0 %v1262_v41 }
 0xcaa   :  { %v3885_v37 = vpop.eup %3884  ;;  %3615 = vmatprep.subr.bf16.mxu0 %v3968_v15 }
 0xcab   :  { %v1158_v39 = vmul.f32 %v3885_v37, %v3881_v27  ;;  %v3831_v37 = vld [vmem:[%s4781_s12 + $0x28] sm:$0xff]  }
 0xcad   :  { %v1160_v38 = vpack.c.bf16 %v1158_v39, %v1158_v39  ;;  %v3832_v39 = vld [vmem:[%s4781_s12 + $0x30] sm:$0xff]  }
 0xcaf   :  { %3598 = vmatmul.mubr.msk.bf16.vlgmr.msra.gmra.mrb[40].mxu1 %vm232_vm2, %v1160_v38  ;;  %v3833_v38 = vld [vmem:[%s4781_s12 + $0x38] sm:$0xff]  }
 0xcb0   :  { %3611 = vmatprep.mubr.msk.bf16.mxu1 %vm3969_vm1, %v3968_v15 }
 0xd7b   :  { %v1203_v43 = vpop.f32.mrb[32].mxu0 }
 0xd7c   :  { %v3593_v44 = vpop.f32.mrb[33].mxu0 }
 0xd7d   :  { %v1206_v45 = vpop.f32.mrb[34].mxu0 }
 0xd7e   :  { %v3594_v49 = vpop.f32.mrb[35].mxu0 }
 0xd82   :  { %v1251_v46 = vpop.f32.mrb[40].mxu1 }
 0xd83   :  { %v1257_v47 = vpack.c.bf16 %v1251_v46, %v1203_v43  ;;  %v3599_v48 = vpop.f32.mrb[41].mxu1 }
 0xd84   :  { %v1254_v51 = vpop.f32.mrb[42].mxu1 }
 0xd85   :  { %v3600_v52 = vpop.f32.mrb[43].mxu1  ;;  %3604 = vmatmul.mubr.msk.bf16.vlgmr.msra.gmra.mrb[36].mxu0 %vm232_vm2, %v1257_v47 }
 0xd86   :  { %3631 = vmatprep.mubr.msk.bf16.mxu0 %vm3969_vm1, %v3968_v15  ;;  %3616 = vmatpush3.bf16.msra.mxu0 %v3826_v30 }
 0xd87   :  { %3617 = vmatprep.subr.bf16.mxu0 %v3968_v15 }
 0xd8a   :  { %3618 = vmatpush3.bf16.msra.mxu0 %v3827_v33 }
 0xd8b   :  { %3619 = vmatprep.subr.bf16.mxu0 %v3968_v15 }
 0xd8e   :  { %3620 = vmatpush3.bf16.msra.mxu0 %v3828_v34 }
 0xd8f   :  { %3621 = vmatprep.subr.bf16.mxu0 %v3968_v15 }
 0xd92   :  { %3622 = vmatpush3.bf16.msra.mxu0 %v3829_v35  ;;  %v3275_v35 = vld [vmem:[%s4783_s14] ss:$0 sm:$0xff] }
 0xd93   :  { %3623 = vmatprep.subr.bf16.mxu0 %v3968_v15 }
 0xd96   :  { %3624 = vmatpush3.bf16.msra.mxu0 %v3830_v36 }
 0xd97   :  { %3625 = vmatprep.subr.bf16.mxu0 %v3968_v15 }
 0xd9a   :  { %3626 = vmatpush3.bf16.msra.mxu0 %v3831_v37 }
 0xd9b   :  { %3627 = vmatprep.subr.bf16.mxu0 %v3968_v15 }
 0xd9e   :  { %3628 = vmatpush3.bf16.msra.mxu0 %v3832_v39 }
 0xd9f   :  { %3629 = vmatprep.subr.bf16.mxu0 %v3968_v15 }
 0xda2   :  { %3630 = vmatpush3.bf16.msra.mxu0 %v3833_v38 }
 0xda3   :  { %3661 = vmatprep.subr.bf16.mxu0 %v3968_v15 }
 0xe58   :  { %v1298_v53 = vpop.f32.mrb[36].mxu0 }
 0xe59   :  { %v1305_v55 = vadd.f32 %v1298_v53, %v1035_v12  ;;  %v3605_v56 = vpop.f32.mrb[37].mxu0 }
 0xe5a   :  { %v1301_v57 = vpop.f32.mrb[38].mxu0 }
 0xe5b   :  { %v1314_v58 = vadd.f32 %v3259_v54, %v1305_v55  ;;  %v1306_v59 = vadd.f32 %v1301_v57, %v1036_v17  ;;  %v3606_v60 = vpop.f32.mrb[39].mxu0 }
 0xe5d   :  { %v1315_v61 = vadd.f32 %v3259_v54, %v1306_v59  ;;  %v1316_v62 = vadd.f32 %v1314_v58, %v4118_v31 }
 0xe5f   :  { %v1320_v63 = vsel %vm71_vm0, %v1316_v62, 0.0  ;;  %v1317_v0 = vadd.f32 %v1315_v61, %v4120_v32  ;;  %v3824_v32 = vld [vmem:[%s4779_s10] sm:$0xff]  }
 0xe60   :  { %1321 = vadd.xlane.f32.xlu1 %v1320_v63  ;;  %3608 = vmatpush3.bf16.msra.mxu1 %v3824_v32 }
 0xe61   :  { %v1323_v3 = vsel %vm71_vm0, %v1317_v0, 0.0  ;;  %3609 = vmatprep.subr.bf16.mxu1 %v3968_v15 }
 0xe62   :  { %1324 = vadd.xlane.f32.xlu0 %v1323_v3 }
 0xe64   :  { %3610 = vmatpush3.bf16.msra.mxu1 %v3825_v16 }
 0xe65   :  { %3635 = vmatprep.subr.bf16.mxu1 %v3968_v15 }
 0xeed   :  { %v1322_v4 = vpop.xlane.xlu1 %1321 }
 0xeee   :  { %v1326_v5 = vmul.f32 0.03125, %v1322_v4 }
 0xeef   :  { %v1325_v6 = vpop.xlane.xlu0 %1324 }
 0xef0   :  { %v1328_v7 = vsub.f32 %v1316_v62, %v1326_v5  ;;  %v1327_v8 = vmul.f32 0.03125, %v1325_v6  ;;  %v3266_v6 = vld [vmem:[%s4782_s13] ss:$0 sm:$0xff] }
 0xef2   :  { %v1329_v9 = vsub.f32 %v1317_v0, %v1327_v8  ;;  %v1330_v10 = vmul.f32 %v1328_v7, %v1328_v7 }
 0xef4   :  { %v1332_v12 = vsel %vm71_vm0, %v1330_v10, 0.0  ;;  %v1331_v13 = vmul.f32 %v1329_v9, %v1329_v9 }
 0xef5   :  { %1333 = vadd.xlane.f32.xlu0 %v1332_v12 }
 0xef6   :  { %v1335_v31 = vsel %vm71_vm0, %v1331_v13, 0.0 }
 0xef7   :  { %1336 = vadd.xlane.f32.xlu1 %v1335_v31 }
 0xf82   :  { %v1334_v17 = vpop.xlane.xlu0 %1333 }
 0xf83   :  { %v1338_v50 = vmul.f32 0.03125, %v1334_v17 }
 0xf84   :  { %v1337_v18 = vpop.xlane.xlu1 %1336 }
 0xf85   :  { %v1340_v19 = vadd.f32 1e-12, %v1338_v50  ;;  %v1339_v20 = vmul.f32 0.03125, %v1337_v18 }
 0xf87   :  { %3886 = vrsqrt.f32 %v1340_v19  ;;  %v1341_v21 = vadd.f32 1e-12, %v1339_v20 }
 0xf89   :  { %3888 = vrsqrt.f32 %v1341_v21 }
 0xf91   :  { %v3887_v22 = vpop.eup %3886 }
 0xf92   :  { %v1344_v24 = vmul.f32 %v3887_v22, %v1328_v7 }
 0xf93   :  { %v3889_v11 = vpop.eup %3888 }
 0xf94   :  { %v1352_v25 = vmul.f32 %v3260_v23, %v1344_v24  ;;  %v1345_v26 = vmul.f32 %v3889_v11, %v1329_v9 }
 0xf96   :  { %v1353_v27 = vmul.f32 %v3260_v23, %v1345_v26  ;;  %v4365_v28 = vadd.f32 %v3261_v14, %v1352_v25  ;;  %v3834_v26 = vld [vmem:[%s4808_s26 + $0x10] sm:$0xff]  }
 0xf98   :  { %v4367_v29 = vadd.f32 %v3261_v14, %v1353_v27  ;;  %v3835_v14 = vld [vmem:[%s4808_s26 + $0x18] sm:$0xff]  }
 0xf9a   :  { %v1362_v42 = vpack.c.bf16 %v4367_v29, %v4365_v28 }
 0xf9c   :  { %3612 = vmatmul.mubr.msk.bf16.vlgmr.msra.gmra.mrb[44].mxu1 %vm71_vm0, %v1362_v42 }
 0xf9d   :  { %3639 = vmatprep.mubr.msk.bf16.mxu1 %vm3969_vm1, %v3968_v15  ;;  %3636 = vmatpush3.bf16.msra.mxu1 %v3834_v26 }
 0xf9e   :  { %3637 = vmatprep.subr.bf16.mxu1 %v3968_v15 }
 0xfa1   :  { %3638 = vmatpush3.bf16.msra.mxu1 %v3835_v14 }
 0xfa2   :  { %3643 = vmatprep.subr.bf16.mxu1 %v3968_v15 }
0x106f   :  { %v1423_v41 = vpop.f32.mrb[44].mxu1 }
0x1070   :  { %v1424_v43 = vadd.f32 %v3262_v40, %v1423_v41  ;;  %v3613_v44 = vpop.f32.mrb[45].mxu1 }
0x1071   :  { %v1426_v45 = vpop.f32.mrb[46].mxu1 }
0x1072   :  { %v1432_v49 = vmul.f32 0.044715, %v1424_v43  ;;  %v1427_v46 = vadd.f32 %v3262_v40, %v1426_v45  ;;  %v3614_v47 = vpop.f32.mrb[47].mxu1  ;;  %v1430_v62 = vmul.f32 0.5, %v1424_v43  ;;  %v3276_v40 = vld [vmem:[%s4784_s15] ss:$0 sm:$0xff] }
0x1074   :  { %v1434_v48 = vmul.f32 %v1432_v49, %v1424_v43  ;;  %v1433_v51 = vmul.f32 0.044715, %v1427_v46  ;;  %v1431_v63 = vmul.f32 0.5, %v1427_v46  ;;  %v3286_v49 = vld [vmem:[%s4774_s5 + $0x1] ss:$0 sm:$0xff]  ;;  %s4812_s5 = smov 112  }
0x1076   :  { %v1436_v52 = vmul.f32 %v1434_v48, %v1424_v43  ;;  %v1435_v53 = vmul.f32 %v1433_v51, %v1427_v46 }
0x1078   :  { %v1438_v54 = vadd.f32 %v1436_v52, %v1424_v43  ;;  %v1437_v55 = vmul.f32 %v1435_v53, %v1427_v46 }
0x107a   :  { %v1440_v56 = vmul.f32 0.7978846, %v1438_v54  ;;  %v1439_v57 = vadd.f32 %v1437_v55, %v1427_v46 }
0x107c   :  { %3890 = vtanh.f32 %v1440_v56  ;;  %v1441_v58 = vmul.f32 0.7978846, %v1439_v57 }
0x107e   :  { %3892 = vtanh.f32 %v1441_v58 }
0x1086   :  { %v3891_v59 = vpop.eup %3890 }
0x1087   :  { %v1444_v60 = vadd.f32 1.0, %v3891_v59 }
0x1088   :  { %v3893_v61 = vpop.eup %3892 }
0x1089   :  { %v1445_v0 = vadd.f32 1.0, %v3893_v61  ;;  %v1446_v3 = vmul.f32 %v1444_v60, %v1430_v62 }
0x108b   :  { %v1447_v4 = vmul.f32 %v1445_v0, %v1431_v63 }
0x108d   :  { %v1448_v5 = vpack.c.bf16 %v1447_v4, %v1446_v3 }
0x108f   :  { %3632 = vmatmul.mubr.bf16.vlgmr.msra.gmra.mrb[40].mxu0 %v1448_v5 }
0x1090   :  { %3663 = vmatprep.mubr.msk.bf16.mxu0 %vm3969_vm1, %v3968_v15 }
0x1162   :  { %v1554_v7 = vpop.f32.mrb[40].mxu0 }
0x1163   :  { %v1555_v8 = vadd.f32 %v3266_v6, %v1554_v7  ;;  %v3633_v9 = vpop.f32.mrb[41].mxu0 }
0x1164   :  { %v1557_v10 = vpop.f32.mrb[42].mxu0 }
0x1165   :  { %v1558_v12 = vadd.f32 %v3266_v6, %v1557_v10  ;;  %v3634_v13 = vpop.f32.mrb[43].mxu0  ;;  %v1561_v31 = vadd.f32 %v1555_v8, %v4365_v28 }
0x1167   :  { %v1565_v32 = vsel %vm71_vm0, %v1561_v31, 0.0  ;;  %v1562_v16 = vadd.f32 %v1558_v12, %v4367_v29 }
0x1168   :  { %1566 = vadd.xlane.f32.xlu0 %v1565_v32 }
0x1169   :  { %v1568_v17 = vsel %vm71_vm0, %v1562_v16, 0.0 }
0x116a   :  { %1569 = vadd.xlane.f32.xlu1 %v1568_v17 }
0x11f5   :  { %v1567_v50 = vpop.xlane.xlu0 %1566 }
0x11f6   :  { %v1571_v18 = vmul.f32 0.03125, %v1567_v50 }
0x11f7   :  { %v1570_v19 = vpop.xlane.xlu1 %1569 }
0x11f8   :  { %v1573_v20 = vsub.f32 %v1561_v31, %v1571_v18  ;;  %v1572_v21 = vmul.f32 0.03125, %v1570_v19 }
0x11fa   :  { %v1574_v22 = vsub.f32 %v1562_v16, %v1572_v21  ;;  %v1575_v23 = vmul.f32 %v1573_v20, %v1573_v20 }
0x11fc   :  { %v1577_v24 = vsel %vm71_vm0, %v1575_v23, 0.0  ;;  %v1576_v11 = vmul.f32 %v1574_v22, %v1574_v22 }
0x11fd   :  { %1578 = vadd.xlane.f32.xlu0 %v1577_v24 }
0x11fe   :  { %v1580_v25 = vsel %vm71_vm0, %v1576_v11, 0.0 }
0x11ff   :  { %1581 = vadd.xlane.f32.xlu1 %v1580_v25 }
0x128a   :  { %v1579_v27 = vpop.xlane.xlu0 %1578 }
0x128b   :  { %v1583_v28 = vmul.f32 0.03125, %v1579_v27 }
0x128c   :  { %v1582_v29 = vpop.xlane.xlu1 %1581 }
0x128d   :  { %v1585_v42 = vadd.f32 1e-12, %v1583_v28  ;;  %v1584_v30 = vmul.f32 0.03125, %v1582_v29 }
0x128f   :  { %3894 = vrsqrt.f32 %v1585_v42  ;;  %v1586_v33 = vadd.f32 1e-12, %v1584_v30 }
0x1291   :  { %3896 = vrsqrt.f32 %v1586_v33 }
0x1299   :  { %v3895_v34 = vpop.eup %3894 }
0x129a   :  { %v1589_v36 = vmul.f32 %v3895_v34, %v1573_v20 }
0x129b   :  { %v3897_v37 = vpop.eup %3896 }
0x129c   :  { %v1597_v39 = vmul.f32 %v3275_v35, %v1589_v36  ;;  %v1590_v38 = vmul.f32 %v3897_v37, %v1574_v22 }
0x129e   :  { %v1598_v41 = vmul.f32 %v3275_v35, %v1590_v38  ;;  %v4434_v43 = vadd.f32 %v3276_v40, %v1597_v39 }
0x12a0   :  { %v4436_v44 = vadd.f32 %v3276_v40, %v1598_v41 }
0x12a2   :  { %v1617_v45 = vpack.c.bf16 %v4436_v44, %v4434_v43 }
0x12a4   :  { %3640 = vmatmul.mubr.msk.bf16.vlgmr.msra.gmra.mrb[48].mxu1 %vm71_vm0, %v1617_v45 }
0x12a5   :  { %3645 = vmatprep.mubr.msk.bf16.mxu1 %vm3969_vm1, %v3968_v15 }
0x1377   :  { %v1675_v46 = vpop.f32.mrb[48].mxu1 }
0x1378   :  { %v1676_v47 = vadd.f32 %v3286_v49, %v1675_v46  ;;  %v3641_v48 = vpop.f32.mrb[49].mxu1 }
0x1379   :  { %v1678_v51 = vpop.f32.mrb[50].mxu1 }
0x137a   :  { %v4446_v52 = vpack.c.bf16 %v1676_v47, %v1676_v47  ;;  %v1679_v53 = vadd.f32 %v3286_v49, %v1678_v51  ;;  %v3642_v54 = vpop.f32.mrb[51].mxu1  ;;  %v1682_v58 = vmul.f32 0.35355338, %v1676_v47 }
0x137c   :  { %v4448_v55 = vpack.c.bf16 %v1679_v53, %v1679_v53  ;;  %1689 = vrot.lane.b32.xlu0 %v4446_v52, %s3970_s24  ;;  %v4456_v60 = vpack.c.bf16 %v1682_v58, %v1682_v58  ;;  %v1683_v62 = vmul.f32 0.35355338, %v1679_v53 }
0x137e   :  { %1738 = vrot.lane.b32.xlu1 %v4448_v55, %s3970_s24  ;;  %v4464_v63 = vpack.c.bf16 %v1683_v62, %v1683_v62 }
0x13ee   :  { %v1690_v56 = vpop.permute.xlu0 %1689 }
0x13ef   :  { %v1695_v57 = vsel %vm232_vm2, %v1690_v56, 0 }
0x13f0   :  { %3644 = vmatpush3.bf16.xpose.msra.mxu1 %v1695_v57  ;;  %v1739_v59 = vpop.permute.xlu1 %1738 }
0x13f1   :  { %3649 = vmatprep.subr.bf16.mxu1 %v3968_v15  ;;  %v1744_v61 = vsel %vm232_vm2, %v1739_v59, 0 }
0x13f7   :  { %3646 = vmatmul.mubr.msk.bf16.vlgmr.msra.gmra.mrb[52].mxu1 %vm232_vm2, %v4456_v60 }
0x13f8   :  { %3650 = vmatpush3.bf16.xpose.msra.mxu1 %v1744_v61  ;;  %3651 = vmatprep.mubr.msk.bf16.mxu1 %vm3969_vm1, %v3968_v15 }
0x13f9   :  { %3655 = vmatprep.subr.bf16.mxu1 %v3968_v15 }
0x13ff   :  { %3652 = vmatmul.mubr.msk.bf16.vlgmr.msra.gmra.mrb[56].mxu1 %vm232_vm2, %v4464_v63 }
0x1400   :  { %3657 = vmatprep.mubr.msk.bf16.mxu1 %vm3969_vm1, %v3968_v15 }
0x14ca   :  { %v1731_v0 = vpop.f32.mrb[52].mxu1 }
0x14cb   :  { %v1732_v3 = vadd.f32 %v1731_v0, %v4157_v1  ;;  %v3647_v4 = vpop.f32.mrb[53].mxu1 }
0x14cc   :  { %v1734_v5 = vpop.f32.mrb[54].mxu1 }
0x14cd   :  { %v3648_v6 = vpop.f32.mrb[55].mxu1  ;;  %v1786_v7 = vsel %vm232_vm2, %v1732_v3, -inf }
0x14ce   :  { %1787 = vmax.xlane.f32.xlu1 %v1786_v7 }
0x14d2   :  { %v1780_v8 = vpop.f32.mrb[56].mxu1 }
0x14d3   :  { %v1781_v9 = vadd.f32 %v1780_v8, %v4159_v2  ;;  %v3653_v10 = vpop.f32.mrb[57].mxu1 }
0x14d4   :  { %v1783_v12 = vpop.f32.mrb[58].mxu1 }
0x14d5   :  { %v3654_v13 = vpop.f32.mrb[59].mxu1  ;;  %v1789_v31 = vsel %vm232_vm2, %v1781_v9, -inf }
0x14d6   :  { %1790 = vmax.xlane.f32.xlu0 %v1789_v31 }
0x14df   :  { %1858 = vrot.lane.b32.xlu1 %v4448_v55, %s3972_s27 }
0x14e3   :  { %1910 = vrot.lane.b32.xlu1 %v4446_v52, %s3973_s28 }
0x155b   :  { %v1788_v32 = vpop.xlane.xlu1 %1787 }
0x155c   :  { %v1792_v16 = vsub.f32 %v1732_v3, %v1788_v32 }
0x155e   :  { %v1794_v17 = vmul.f32 1.442695, %v1792_v16 }
0x155f   :  { %v1859_v50 = vpop.permute.xlu1 %1858 }
0x1560   :  { %3898 = vpow2.f32 %v1794_v17  ;;  %v1864_v18 = vsel %vm357_vm3, %v1859_v50, 0 }
0x1561   :  { %3662 = vmatpush3.bf16.msra.mxu0 %v1864_v18 }
0x1562   :  { %3673 = vmatprep.subr.bf16.mxu0 %v3968_v15 }
0x1563   :  { %v1791_v19 = vpop.xlane.xlu0 %1790  ;;  %v1911_v26 = vpop.permute.xlu1 %1910 }
0x1564   :  { %v1793_v20 = vsub.f32 %v1781_v9, %v1791_v19  ;;  %v1916_v33 = vsel %vm232_vm2, %v1911_v26, 0 }
0x1566   :  { %v1796_v21 = vmul.f32 1.442695, %v1793_v20 }
0x1568   :  { %3900 = vpow2.f32 %v1796_v21 }
0x156a   :  { %v3899_v22 = vpop.eup %3898 }
0x156b   :  { %v1798_v23 = vsel %vm232_vm2, %v3899_v22, 0.0 }
0x156c   :  { %1799 = vadd.xlane.f32.xlu0 %v1798_v23 }
0x1572   :  { %v3901_v24 = vpop.eup %3900 }
0x1573   :  { %v1801_v11 = vsel %vm232_vm2, %v3901_v24, 0.0 }
0x1574   :  { %1802 = vadd.xlane.f32.xlu1 %v1801_v11 }
0x1582   :  { %1810 = vrot.lane.b32.xlu0 %v4446_v52, %s3972_s27 }
0x1585   :  { %1961 = vrot.lane.b32.xlu1 %v4448_v55, %s3973_s28 }
0x1586   :  { %1908 = vrot.lane.b32.xlu0 %v4456_v60, %s3974_s4 }
0x1589   :  { %1959 = vrot.lane.b32.xlu1 %v4464_v63, %s3974_s4 }
0x15f9   :  { %v1800_v25 = vpop.xlane.xlu0 %1799 }
0x15fa   :  { %3902 = vrcp.f32 %v1800_v25 }
0x15fd   :  { %v1811_v14 = vpop.permute.xlu0 %1810 }
0x15fe   :  { %v1816_v27 = vsel %vm357_vm3, %v1811_v14, 0  ;;  %v3281_v14 = vld [vmem:[%s4775_s6 + $0x10] sm:$0xf] }
0x15ff   :  { %3656 = vmatpush3.bf16.msra.mxu1 %v1816_v27 }
0x1600   :  { %3667 = vmatprep.subr.bf16.mxu1 %v3968_v15 }
0x1601   :  { %v1803_v28 = vpop.xlane.xlu1 %1802  ;;  %v1909_v39 = vpop.permute.xlu0 %1908 }
0x1602   :  { %3904 = vrcp.f32 %v1803_v28 }
0x1604   :  { %v3903_v29 = vpop.eup %3902 }
0x1605   :  { %v1806_v42 = vmul.f32 %v3903_v29, %v3899_v22  ;;  %v1962_v36 = vpop.permute.xlu1 %1961  ;;  %v2181_v29 = vsel %vm357_vm3, %v3281_v14, 0 }
0x1606   :  { %v1967_v38 = vsel %vm232_vm2, %v1962_v36, 0 }
0x1607   :  { %v1808_v30 = vpack.c.bf16 %v1806_v42, %v1806_v42 }
0x1609   :  { %3658 = vmatmul.mubr.msk.bf16.vlgmr.msra.gmra.mrb[60].mxu1 %vm232_vm2, %v1808_v30  ;;  %v1960_v40 = vpop.permute.xlu1 %1959 }
0x160a   :  { %3668 = vmatpush3.bf16.xpose.msra.mxu1 %v1916_v33  ;;  %3669 = vmatprep.mubr.msk.bf16.mxu1 %vm3969_vm1, %v3968_v15 }
0x160b   :  { %3679 = vmatprep.subr.bf16.mxu1 %v3968_v15 }
0x160c   :  { %v3905_v34 = vpop.eup %3904 }
0x160d   :  { %v1807_v35 = vmul.f32 %v3905_v34, %v3901_v24 }
0x160f   :  { %v1809_v37 = vpack.c.bf16 %v1807_v35, %v1807_v35  ;;  %v3282_v35 = vld [vmem:[%s4775_s6 + $0x14] sm:$0xf] }
0x1610   :  { %v2134_v36 = vsel %vm357_vm3, %v3282_v35, 0 }
0x1611   :  { %3664 = vmatmul.mubr.msk.bf16.vlgmr.msra.gmra.mrb[44].mxu0 %vm232_vm2, %v1809_v37  ;;  %3670 = vmatmul.mubr.msk.bf16.vlgmr.msra.gmra.mrb[64].mxu1 %vm232_vm2, %v1909_v39 }
0x1612   :  { %3674 = vmatpush3.bf16.xpose.msra.mxu0 %v1967_v38  ;;  %3675 = vmatprep.mubr.msk.bf16.mxu0 %vm3969_vm1, %v3968_v15 }
0x1613   :  { %3685 = vmatprep.subr.bf16.mxu0 %v3968_v15  ;;  %3681 = vmatprep.mubr.msk.bf16.mxu1 %vm3969_vm1, %v3968_v15 }
0x1619   :  { %3676 = vmatmul.mubr.msk.bf16.vlgmr.msra.gmra.mrb[48].mxu0 %vm232_vm2, %v1960_v40 }
0x161a   :  { %3687 = vmatprep.mubr.msk.bf16.mxu0 %vm3969_vm1, %v3968_v15 }
0x16dc   :  { %v4508_v41 = vpop.f32.mrb[60].mxu1 }
0x16dd   :  { %v3659_v45 = vpop.f32.mrb[61].mxu1 }
0x16de   :  { %v1855_v49 = vpop.f32.mrb[62].mxu1 }
0x16df   :  { %v3660_v46 = vpop.f32.mrb[63].mxu1 }
0x16e4   :  { %v4510_v47 = vpop.f32.mrb[44].mxu0  ;;  %v1952_v48 = vpop.f32.mrb[64].mxu1 }
0x16e5   :  { %v1906_v51 = vpack.c.bf16 %v4510_v47, %v4508_v41  ;;  %v1953_v53 = vadd.f32 %v1952_v48, %v4157_v1  ;;  %v3665_v54 = vpop.f32.mrb[45].mxu0  ;;  %v3671_v56 = vpop.f32.mrb[65].mxu1 }
0x16e6   :  { %v1903_v57 = vpop.f32.mrb[46].mxu0  ;;  %v1955_v58 = vpop.f32.mrb[66].mxu1 }
0x16e7   :  { %v3666_v59 = vpop.f32.mrb[47].mxu0  ;;  %v3672_v61 = vpop.f32.mrb[67].mxu1  ;;  %v2009_v62 = vsel %vm232_vm2, %v1953_v53, -inf }
0x16e8   :  { %2010 = vmax.xlane.f32.xlu0 %v2009_v62 }
0x16ec   :  { %v2003_v0 = vpop.f32.mrb[48].mxu0 }
0x16ed   :  { %v2004_v3 = vadd.f32 %v2003_v0, %v4159_v2  ;;  %v3677_v4 = vpop.f32.mrb[49].mxu0 }
0x16ee   :  { %v2006_v5 = vpop.f32.mrb[50].mxu0 }
0x16ef   :  { %v3678_v6 = vpop.f32.mrb[51].mxu0  ;;  %v2012_v7 = vsel %vm232_vm2, %v2004_v3, -inf }
0x16f0   :  { %2013 = vmax.xlane.f32.xlu1 %v2012_v7 }
0x1701   :  { %2081 = vrot.lane.b32.xlu1 %v4448_v55, %s3975_s29 }
0x1705   :  { %2226 = vrot.lane.b32.xlu1 %v4446_v52, %s3976_s30 }
0x1709   :  { %2276 = vrot.lane.b32.xlu1 %v4448_v55, %s3976_s30  ;;  %s4814_s30 = smov 72  }
0x170d   :  { %2274 = vrot.lane.b32.xlu1 %v4464_v63, %s4812_s5 }
0x1775   :  { %v2011_v8 = vpop.xlane.xlu0 %2010 }
0x1776   :  { %v2015_v9 = vsub.f32 %v1953_v53, %v2011_v8 }
0x1778   :  { %v2017_v10 = vmul.f32 1.442695, %v2015_v9 }
0x177a   :  { %3906 = vpow2.f32 %v2017_v10 }
0x177d   :  { %v2014_v12 = vpop.xlane.xlu1 %2013 }
0x177e   :  { %v2016_v13 = vsub.f32 %v2004_v3, %v2014_v12 }
0x1780   :  { %v2019_v31 = vmul.f32 1.442695, %v2016_v13 }
0x1781   :  { %v2082_v32 = vpop.permute.xlu1 %2081 }
0x1782   :  { %3908 = vpow2.f32 %v2019_v31  ;;  %v2087_v16 = vsel %vm357_vm3, %v2082_v32, 0 }
0x1783   :  { %3686 = vmatpush3.bf16.msra.mxu0 %v2087_v16 }
0x1784   :  { %v3907_v17 = vpop.eup %3906  ;;  %3697 = vmatprep.subr.bf16.mxu0 %v3968_v15 }
0x1785   :  { %v2021_v50 = vsel %vm232_vm2, %v3907_v17, 0.0  ;;  %v2227_v42 = vpop.permute.xlu1 %2226 }
0x1786   :  { %2022 = vadd.xlane.f32.xlu0 %v2021_v50  ;;  %v2232_v47 = vsel %vm232_vm2, %v2227_v42, 0 }
0x1789   :  { %v2277_v30 = vpop.permute.xlu1 %2276 }
0x178a   :  { %v2282_v33 = vsel %vm232_vm2, %v2277_v30, 0 }
0x178c   :  { %v3909_v18 = vpop.eup %3908 }
0x178d   :  { %v2024_v19 = vsel %vm232_vm2, %v3909_v18, 0.0  ;;  %v2275_v34 = vpop.permute.xlu1 %2274 }
0x178e   :  { %2025 = vadd.xlane.f32.xlu0 %v2024_v19 }
0x17a4   :  { %2033 = vrot.lane.b32.xlu0 %v4446_v52, %s3975_s29  ;;  %s4813_s29 = smov 48  }
0x17a8   :  { %2224 = vrot.lane.b32.xlu0 %v4456_v60, %s4812_s5 }
0x1813   :  { %v2023_v20 = vpop.xlane.xlu0 %2022 }
0x1814   :  { %3910 = vrcp.f32 %v2023_v20 }
0x181b   :  { %v2026_v21 = vpop.xlane.xlu0 %2025 }
0x181c   :  { %3912 = vrcp.f32 %v2026_v21 }
0x181e   :  { %v3911_v22 = vpop.eup %3910 }
0x181f   :  { %v2029_v23 = vmul.f32 %v3911_v22, %v3907_v17  ;;  %v2034_v24 = vpop.permute.xlu0 %2033 }
0x1820   :  { %v2039_v11 = vsel %vm357_vm3, %v2034_v24, 0 }
0x1821   :  { %3680 = vmatpush3.bf16.msra.mxu1 %v2039_v11  ;;  %v2031_v25 = vpack.c.bf16 %v2029_v23, %v2029_v23 }
0x1822   :  { %3691 = vmatprep.subr.bf16.mxu1 %v3968_v15 }
0x1823   :  { %v2225_v54 = vpop.permute.xlu0 %2224 }
0x1824   :  { %3682 = vmatmul.mubr.msk.bf16.vlgmr.msra.gmra.mrb[68].mxu1 %vm232_vm2, %v2031_v25 }
0x1825   :  { %3693 = vmatprep.mubr.msk.bf16.mxu1 %vm3969_vm1, %v3968_v15  ;;  %3692 = vmatpush3.bf16.msra.mxu1 %v2134_v36 }
0x1826   :  { %v3913_v26 = vpop.eup %3912  ;;  %3703 = vmatprep.subr.bf16.mxu1 %v3968_v15 }
0x1827   :  { %v2030_v27 = vmul.f32 %v3913_v26, %v3909_v18 }
0x1829   :  { %v2032_v28 = vpack.c.bf16 %v2030_v27, %v2030_v27 }
0x182b   :  { %3688 = vmatmul.mubr.msk.bf16.vlgmr.msra.gmra.mrb[52].mxu0 %vm232_vm2, %v2032_v28 }
0x182c   :  { %3698 = vmatpush3.bf16.msra.mxu0 %v2181_v29  ;;  %3699 = vmatprep.mubr.msk.bf16.mxu0 %vm3969_vm1, %v3968_v15 }
0x182d   :  { %3709 = vmatprep.subr.bf16.mxu0 %v3968_v15 }
0x1833   :  { %3700 = vmatmul.mubr.msk.bf16.vlgmr.msra.gmra.mrb[56].mxu0 %vm232_vm2, %v1906_v51 }
0x1834   :  { %3711 = vmatprep.mubr.msk.bf16.mxu0 %vm3969_vm1, %v3968_v15 }
0x1835   :  { %3710 = vmatpush3.bf16.xpose.msra.mxu0 %v2282_v33 }
0x1836   :  { %3721 = vmatprep.subr.bf16.mxu0 %v3968_v15 }
0x183c   :  { %3712 = vmatmul.mubr.msk.bf16.vlgmr.msra.gmra.mrb[60].mxu0 %vm232_vm2, %v2275_v34 }
0x183d   :  { %3723 = vmatprep.mubr.msk.bf16.mxu0 %vm3969_vm1, %v3968_v15 }
0x18f7   :  { %v2075_v37 = vpop.f32.mrb[68].mxu1 }
0x18f8   :  { %v3683_v39 = vpop.f32.mrb[69].mxu1 }
0x18f9   :  { %v2078_v38 = vpop.f32.mrb[70].mxu1 }
0x18fa   :  { %v3684_v40 = vpop.f32.mrb[71].mxu1 }
0x18fe   :  { %v2123_v41 = vpop.f32.mrb[52].mxu0 }
0x18ff   :  { %v2129_v45 = vpack.c.bf16 %v2123_v41, %v2075_v37  ;;  %v3689_v49 = vpop.f32.mrb[53].mxu0 }
0x1900   :  { %v2126_v46 = vpop.f32.mrb[54].mxu0 }
0x1901   :  { %v3690_v48 = vpop.f32.mrb[55].mxu0  ;;  %3694 = vmatmul.mubr.msk.bf16.vlgmr.msra.gmra.mrb[72].mxu1 %vm232_vm2, %v2129_v45  ;;  %v3283_v45 = vld [vmem:[%s4775_s6 + $0x18] sm:$0xf] }
0x1902   :  { %3704 = vmatpush3.bf16.xpose.msra.mxu1 %v2232_v47  ;;  %3705 = vmatprep.mubr.msk.bf16.mxu1 %vm3969_vm1, %v3968_v15  ;;  %v2449_v49 = vsel %vm357_vm3, %v3283_v45, 0 }
0x1903   :  { %3715 = vmatprep.subr.bf16.mxu1 %v3968_v15 }
0x1906   :  { %v2217_v51 = vpop.f32.mrb[56].mxu0 }
0x1907   :  { %v3701_v53 = vpop.f32.mrb[57].mxu0 }
0x1908   :  { %v2220_v56 = vpop.f32.mrb[58].mxu0 }
0x1909   :  { %v3702_v57 = vpop.f32.mrb[59].mxu0  ;;  %3706 = vmatmul.mubr.msk.bf16.vlgmr.msra.gmra.mrb[76].mxu1 %vm232_vm2, %v2225_v54 }
0x190a   :  { %3717 = vmatprep.mubr.msk.bf16.mxu1 %vm3969_vm1, %v3968_v15 }
0x190f   :  { %v2318_v58 = vpop.f32.mrb[60].mxu0 }
0x1910   :  { %v2319_v59 = vadd.f32 %v2318_v58, %v4159_v2  ;;  %v3713_v61 = vpop.f32.mrb[61].mxu0 }
0x1911   :  { %v2321_v62 = vpop.f32.mrb[62].mxu0 }
0x1912   :  { %v3714_v0 = vpop.f32.mrb[63].mxu0  ;;  %v2327_v3 = vsel %vm232_vm2, %v2319_v59, -inf }
0x1913   :  { %2328 = vmax.xlane.f32.xlu1 %v2327_v3 }
0x1924   :  { %2396 = vrot.lane.b32.xlu1 %v4448_v55, %s4813_s29 }
0x1928   :  { %2496 = vrot.lane.b32.xlu1 %v4446_v52, %s4814_s30 }
0x192c   :  { %2546 = vrot.lane.b32.xlu1 %v4448_v55, %s4814_s30 }
0x1930   :  { %2544 = vrot.lane.b32.xlu1 %v4464_v63, %s4815_s3 }
0x19a0   :  { %v2329_v4 = vpop.xlane.xlu1 %2328 }
0x19a1   :  { %v2331_v7 = vsub.f32 %v2319_v59, %v2329_v4 }
0x19a3   :  { %v2334_v8 = vmul.f32 1.442695, %v2331_v7 }
0x19a4   :  { %v2397_v5 = vpop.permute.xlu1 %2396 }
0x19a5   :  { %v2402_v6 = vsel %vm357_vm3, %v2397_v5, 0  ;;  %3914 = vpow2.f32 %v2334_v8 }
0x19a6   :  { %3722 = vmatpush3.bf16.msra.mxu0 %v2402_v6 }
0x19a7   :  { %3733 = vmatprep.subr.bf16.mxu0 %v3968_v15 }
0x19a8   :  { %v2497_v28 = vpop.permute.xlu1 %2496 }
0x19a9   :  { %v2502_v42 = vsel %vm232_vm2, %v2497_v28, 0 }
0x19af   :  { %v3915_v20 = vpop.eup %3914 }
0x19b0   :  { %v2339_v21 = vsel %vm232_vm2, %v3915_v20, 0.0 }
0x19d4   :  { %v2170_v9 = vpop.f32.mrb[72].mxu1 }
0x19d5   :  { %v4583_v10 = vadd.f32 %v2217_v51, %v2170_v9  ;;  %v3695_v12 = vpop.f32.mrb[73].mxu1 }
0x19d6   :  { %v2173_v13 = vpop.f32.mrb[74].mxu1 }
0x19d7   :  { %v4585_v31 = vadd.f32 %v2220_v56, %v2173_v13  ;;  %v3696_v32 = vpop.f32.mrb[75].mxu1  ;;  %v2547_v56 = vpop.permute.xlu1 %2546 }
0x19d8   :  { %v2552_v62 = vsel %vm232_vm2, %v2547_v56, 0 }
0x19dc   :  { %v2268_v16 = vpop.f32.mrb[76].mxu1 }
0x19dd   :  { %v2269_v63 = vadd.f32 %v2268_v16, %v4157_v1  ;;  %v3707_v17 = vpop.f32.mrb[77].mxu1 }
0x19de   :  { %v2271_v50 = vpop.f32.mrb[78].mxu1 }
0x19df   :  { %v3708_v18 = vpop.f32.mrb[79].mxu1  ;;  %v2324_v19 = vsel %vm232_vm2, %v2269_v63, -inf }
0x19e0   :  { %2325 = vmax.xlane.f32.xlu0 %v2324_v19 }
0x19e4   :  { %2340 = vadd.xlane.f32.xlu0 %v2339_v21 }
0x1a6d   :  { %v2326_v22 = vpop.xlane.xlu0 %2325 }
0x1a6e   :  { %v2330_v23 = vsub.f32 %v2269_v63, %v2326_v22 }
0x1a70   :  { %v2332_v24 = vmul.f32 1.442695, %v2330_v23 }
0x1a71   :  { %v2341_v11 = vpop.xlane.xlu0 %2340 }
0x1a72   :  { %3916 = vpow2.f32 %v2332_v24 }
0x1a73   :  { %3918 = vrcp.f32 %v2341_v11 }
0x1a7c   :  { %v3917_v25 = vpop.eup %3916 }
0x1a7d   :  { %v3919_v26 = vpop.eup %3918  ;;  %v2336_v14 = vsel %vm232_vm2, %v3917_v25, 0.0 }
0x1a7e   :  { %v2345_v27 = vmul.f32 %v3919_v26, %v3915_v20  ;;  %2337 = vadd.xlane.f32.xlu0 %v2336_v14 }
0x1a80   :  { %v2347_v29 = vpack.c.bf16 %v2345_v27, %v2345_v27 }
0x1a82   :  { %3724 = vmatmul.mubr.msk.bf16.vlgmr.msra.gmra.mrb[64].mxu0 %vm232_vm2, %v2347_v29 }
0x1a83   :  { %3734 = vmatpush3.bf16.xpose.msra.mxu0 %v2502_v42  ;;  %3735 = vmatprep.mubr.msk.bf16.mxu0 %vm3969_vm1, %v3968_v15 }
0x1a84   :  { %3745 = vmatprep.subr.bf16.mxu0 %v3968_v15 }
0x1a94   :  { %2348 = vrot.lane.b32.xlu0 %v4446_v52, %s4813_s29 }
0x1a98   :  { %2494 = vrot.lane.b32.xlu0 %v4456_v60, %s4815_s3 }
0x1b0b   :  { %v2338_v30 = vpop.xlane.xlu0 %2337 }
0x1b0c   :  { %3920 = vrcp.f32 %v2338_v30  ;;  %v3284_v30 = vld [vmem:[%s4775_s6 + $0x1c] sm:$0xf] }
0x1b0f   :  { %v2349_v33 = vpop.permute.xlu0 %2348 }
0x1b10   :  { %v2354_v34 = vsel %vm357_vm3, %v2349_v33, 0  ;;  %v2719_v33 = vsel %vm357_vm3, %v3284_v30, 0 }
0x1b11   :  { %3716 = vmatpush3.bf16.msra.mxu1 %v2354_v34 }
0x1b12   :  { %3727 = vmatprep.subr.bf16.mxu1 %v3968_v15 }
0x1b13   :  { %v2495_v35 = vpop.permute.xlu0 %2494 }
0x1b14   :  { %3736 = vmatmul.mubr.msk.bf16.vlgmr.msra.gmra.mrb[68].mxu0 %vm232_vm2, %v2495_v35 }
0x1b15   :  { %3747 = vmatprep.mubr.msk.bf16.mxu0 %vm3969_vm1, %v3968_v15 }
0x1b16   :  { %v3921_v36 = vpop.eup %3920 }
0x1b17   :  { %v2344_v37 = vmul.f32 %v3921_v36, %v3917_v25 }
0x1b19   :  { %v2346_v39 = vpack.c.bf16 %v2344_v37, %v2344_v37 }
0x1b1b   :  { %3718 = vmatmul.mubr.msk.bf16.vlgmr.msra.gmra.mrb[80].mxu1 %vm232_vm2, %v2346_v39 }
0x1b1c   :  { %3729 = vmatprep.mubr.msk.bf16.mxu1 %vm3969_vm1, %v3968_v15  ;;  %3728 = vmatpush3.bf16.msra.mxu1 %v2449_v49  ;;  %v3311_v49 = vld [vmem:[%s4776_s7 + $0x1] ss:$0 sm:$0xff] }
0x1b1d   :  { %3739 = vmatprep.subr.bf16.mxu1 %v3968_v15 }
0x1b55   :  { %v2438_v60 = vpop.f32.mrb[64].mxu0 }
0x1b56   :  { %v3725_v38 = vpop.f32.mrb[65].mxu0 }
0x1b57   :  { %v2441_v40 = vpop.f32.mrb[66].mxu0 }
0x1b58   :  { %v3726_v41 = vpop.f32.mrb[67].mxu0 }
0x1be7   :  { %v2538_v46 = vpop.f32.mrb[68].mxu0 }
0x1be8   :  { %v2539_v47 = vadd.f32 %v2538_v46, %v4157_v1  ;;  %v3737_v48 = vpop.f32.mrb[69].mxu0  ;;  %v2545_v1 = vpop.permute.xlu1 %2544 }
0x1be9   :  { %v2541_v51 = vpop.f32.mrb[70].mxu0 }
0x1bea   :  { %v3738_v53 = vpop.f32.mrb[71].mxu0  ;;  %v2594_v54 = vsel %vm232_vm2, %v2539_v47, -inf }
0x1beb   :  { %2595 = vmax.xlane.f32.xlu0 %v2594_v54 }
0x1bee   :  { %v2390_v57 = vpop.f32.mrb[80].mxu1 }
0x1bef   :  { %v2444_v58 = vpack.c.bf16 %v2438_v60, %v2390_v57  ;;  %v3719_v59 = vpop.f32.mrb[81].mxu1 }
0x1bf0   :  { %v2393_v61 = vpop.f32.mrb[82].mxu1 }
0x1bf1   :  { %v3720_v0 = vpop.f32.mrb[83].mxu1  ;;  %3730 = vmatmul.mubr.msk.bf16.vlgmr.msra.gmra.mrb[84].mxu1 %vm232_vm2, %v2444_v58 }
0x1bf2   :  { %3740 = vmatpush3.bf16.xpose.msra.mxu1 %v2552_v62  ;;  %3741 = vmatprep.mubr.msk.bf16.mxu1 %vm3969_vm1, %v3968_v15 }
0x1bf3   :  { %3751 = vmatprep.subr.bf16.mxu1 %v3968_v15 }
0x1bf9   :  { %3742 = vmatmul.mubr.msk.bf16.vlgmr.msra.gmra.mrb[88].mxu1 %vm232_vm2, %v2545_v1 }
0x1bfa   :  { %3753 = vmatprep.mubr.msk.bf16.mxu1 %vm3969_vm1, %v3968_v15 }
0x1c78   :  { %v2596_v3 = vpop.xlane.xlu0 %2595 }
0x1c79   :  { %v2600_v4 = vsub.f32 %v2539_v47, %v2596_v3 }
0x1c7b   :  { %v2602_v5 = vmul.f32 1.442695, %v2600_v4 }
0x1c7d   :  { %3922 = vpow2.f32 %v2602_v5 }
0x1c87   :  { %v3923_v6 = vpop.eup %3922 }
0x1c88   :  { %v2606_v7 = vsel %vm232_vm2, %v3923_v6, 0.0 }
0x1c89   :  { %2607 = vadd.xlane.f32.xlu0 %v2606_v7 }
0x1cc4   :  { %v2485_v8 = vpop.f32.mrb[84].mxu1 }
0x1cc5   :  { %v2492_v9 = vadd.f32 %v2485_v8, %v4583_v10  ;;  %v3731_v12 = vpop.f32.mrb[85].mxu1 }
0x1cc6   :  { %v2488_v13 = vpop.f32.mrb[86].mxu1 }
0x1cc7   :  { %v2493_v32 = vadd.f32 %v2488_v13, %v4585_v31  ;;  %v3732_v16 = vpop.f32.mrb[87].mxu1 }
0x1ccc   :  { %v2588_v63 = vpop.f32.mrb[88].mxu1 }
0x1ccd   :  { %v2589_v17 = vadd.f32 %v2588_v63, %v4159_v2  ;;  %v3743_v50 = vpop.f32.mrb[89].mxu1 }
0x1cce   :  { %v2591_v18 = vpop.f32.mrb[90].mxu1 }
0x1ccf   :  { %v3744_v19 = vpop.f32.mrb[91].mxu1  ;;  %v2597_v20 = vsel %vm232_vm2, %v2589_v17, -inf  ;;  %v3314_v18 = vld [vmem:[%s4777_s8 + $0x1] ss:$0 sm:$0xff] }
0x1cd0   :  { %2598 = vmax.xlane.f32.xlu1 %v2597_v20 }
0x1ce1   :  { %2666 = vrot.lane.b32.xlu1 %v4448_v55, %s4816_s21 }
0x1d16   :  { %v2608_v11 = vpop.xlane.xlu0 %2607 }
0x1d5d   :  { %v2599_v21 = vpop.xlane.xlu1 %2598 }
0x1d5e   :  { %v2601_v22 = vsub.f32 %v2589_v17, %v2599_v21 }
0x1d60   :  { %v2604_v10 = vmul.f32 1.442695, %v2601_v22 }
0x1d61   :  { %v2667_v23 = vpop.permute.xlu1 %2666 }
0x1d62   :  { %3924 = vpow2.f32 %v2604_v10  ;;  %v2672_v31 = vsel %vm357_vm3, %v2667_v23, 0  ;;  %v3315_v10 = vld [vmem:[%s4778_s9 + $0x1] ss:$0 sm:$0xff] }
0x1d63   :  { %3752 = vmatpush3.bf16.msra.mxu1 %v2672_v31  ;;  %3926 = vrcp.f32 %v2608_v11  ;;  %v3838_v11 = vld [vmem:[%s4781_s12 + $0x40] sm:$0xff]  }
0x1d64   :  { %3763 = vmatprep.subr.bf16.mxu1 %v3968_v15 }
0x1d6c   :  { %v3925_v2 = vpop.eup %3924 }
0x1d6d   :  { %v2609_v24 = vsel %vm232_vm2, %v3925_v2, 0.0  ;;  %v3927_v55 = vpop.eup %3926 }
0x1d6e   :  { %2610 = vadd.xlane.f32.xlu0 %v2609_v24  ;;  %v2614_v26 = vmul.f32 %v3927_v55, %v3923_v6  ;;  %v3839_v55 = vld [vmem:[%s4781_s12 + $0x48] sm:$0xff]  }
0x1d70   :  { %v2616_v28 = vpack.c.bf16 %v2614_v26, %v2614_v26  ;;  %v3841_v26 = vld [vmem:[%s4781_s12 + $0x58] sm:$0xff]  }
0x1d84   :  { %2618 = vrot.lane.b32.xlu0 %v4446_v52, %s4816_s21 }
0x1dfb   :  { %v2611_v25 = vpop.xlane.xlu0 %2610 }
0x1dfc   :  { %3928 = vrcp.f32 %v2611_v25  ;;  %v3840_v25 = vld [vmem:[%s4781_s12 + $0x50] sm:$0xff]  }
0x1dff   :  { %v2619_v14 = vpop.permute.xlu0 %2618 }
0x1e00   :  { %v2624_v27 = vsel %vm357_vm3, %v2619_v14, 0  ;;  %v3842_v14 = vld [vmem:[%s4781_s12 + $0x60] sm:$0xff]  }
0x1e01   :  { %3746 = vmatpush3.bf16.msra.mxu0 %v2624_v27  ;;  %v3843_v27 = vld [vmem:[%s4781_s12 + $0x68] sm:$0xff]  }
0x1e02   :  { %3757 = vmatprep.subr.bf16.mxu0 %v3968_v15 }
0x1e04   :  { %3748 = vmatmul.mubr.msk.bf16.vlgmr.msra.gmra.mrb[72].mxu0 %vm232_vm2, %v2616_v28  ;;  %v3844_v28 = vld [vmem:[%s4781_s12 + $0x70] sm:$0xff]  }
0x1e05   :  { %3759 = vmatprep.mubr.msk.bf16.mxu0 %vm3969_vm1, %v3968_v15  ;;  %3758 = vmatpush3.bf16.msra.mxu0 %v2719_v33 }
0x1e06   :  { %v3929_v29 = vpop.eup %3928  ;;  %3771 = vmatprep.subr.bf16.mxu0 %v3968_v15 }
0x1e07   :  { %v2615_v52 = vmul.f32 %v3929_v29, %v3925_v2  ;;  %v3845_v29 = vld [vmem:[%s4781_s12 + $0x78] sm:$0xff]  }
0x1e09   :  { %v2617_v42 = vpack.c.bf16 %v2615_v52, %v2615_v52  ;;  %v3321_v52 = vld [vmem:[%s4780_s11 + $0x1] ss:$0 sm:$0xff] }
0x1e0b   :  { %3754 = vmatmul.mubr.msk.bf16.vlgmr.msra.gmra.mrb[92].mxu1 %vm232_vm2, %v2617_v42 }
0x1e0c   :  { %3767 = vmatprep.mubr.msk.bf16.mxu1 %vm3969_vm1, %v3968_v15 }
0x1ed7   :  { %v2660_v34 = vpop.f32.mrb[72].mxu0 }
0x1ed8   :  { %v3749_v35 = vpop.f32.mrb[73].mxu0 }
0x1ed9   :  { %v2663_v36 = vpop.f32.mrb[74].mxu0 }
0x1eda   :  { %v3750_v37 = vpop.f32.mrb[75].mxu0 }
0x1ede   :  { %v2708_v39 = vpop.f32.mrb[92].mxu1 }
0x1edf   :  { %v2714_v60 = vpack.c.bf16 %v2708_v39, %v2660_v34  ;;  %v3755_v38 = vpop.f32.mrb[93].mxu1 }
0x1ee0   :  { %v2711_v40 = vpop.f32.mrb[94].mxu1 }
0x1ee1   :  { %v3756_v41 = vpop.f32.mrb[95].mxu1  ;;  %3760 = vmatmul.mubr.msk.bf16.vlgmr.msra.gmra.mrb[76].mxu0 %vm232_vm2, %v2714_v60 }
0x1ee2   :  { %3787 = vmatprep.mubr.msk.bf16.mxu0 %vm3969_vm1, %v3968_v15  ;;  %3772 = vmatpush3.bf16.msra.mxu0 %v3838_v11 }
0x1ee3   :  { %3773 = vmatprep.subr.bf16.mxu0 %v3968_v15 }
0x1ee6   :  { %3774 = vmatpush3.bf16.msra.mxu0 %v3839_v55  ;;  %v3353_v55 = vld [vmem:[%s4783_s14 + $0x1] ss:$0 sm:$0xff] }
0x1ee7   :  { %3775 = vmatprep.subr.bf16.mxu0 %v3968_v15 }
0x1eea   :  { %3776 = vmatpush3.bf16.msra.mxu0 %v3840_v25 }
0x1eeb   :  { %3777 = vmatprep.subr.bf16.mxu0 %v3968_v15 }
0x1eee   :  { %3778 = vmatpush3.bf16.msra.mxu0 %v3841_v26 }
0x1eef   :  { %3779 = vmatprep.subr.bf16.mxu0 %v3968_v15 }
0x1ef2   :  { %3780 = vmatpush3.bf16.msra.mxu0 %v3842_v14  ;;  %v3354_v14 = vld [vmem:[%s4784_s15 + $0x1] ss:$0 sm:$0xff] }
0x1ef3   :  { %3781 = vmatprep.subr.bf16.mxu0 %v3968_v15 }
0x1ef6   :  { %3782 = vmatpush3.bf16.msra.mxu0 %v3843_v27 }
0x1ef7   :  { %3783 = vmatprep.subr.bf16.mxu0 %v3968_v15 }
0x1efa   :  { %3784 = vmatpush3.bf16.msra.mxu0 %v3844_v28 }
0x1efb   :  { %3785 = vmatprep.subr.bf16.mxu0 %v3968_v15 }
0x1efe   :  { %3786 = vmatpush3.bf16.msra.mxu0 %v3845_v29 }
0x1fb4   :  { %v2755_v45 = vpop.f32.mrb[76].mxu0 }
0x1fb5   :  { %v2762_v46 = vadd.f32 %v2755_v45, %v2492_v9  ;;  %v3761_v47 = vpop.f32.mrb[77].mxu0  ;;  %v3837_v9 = vld [vmem:[%s4779_s10 + $0x18] sm:$0xff]  }
0x1fb6   :  { %v2758_v48 = vpop.f32.mrb[78].mxu0 }
0x1fb7   :  { %v2772_v51 = vadd.f32 %v3311_v49, %v2762_v46  ;;  %v2763_v53 = vadd.f32 %v2758_v48, %v2493_v32  ;;  %v3762_v54 = vpop.f32.mrb[79].mxu0 }
0x1fb9   :  { %v2773_v56 = vadd.f32 %v3311_v49, %v2763_v53  ;;  %v2774_v57 = vadd.f32 %v2772_v51, %v4434_v43 }
0x1fbb   :  { %v2780_v58 = vsel %vm71_vm0, %v2774_v57, 0.0  ;;  %v2775_v59 = vadd.f32 %v2773_v56, %v4436_v44  ;;  %v3836_v44 = vld [vmem:[%s4779_s10 + $0x10] sm:$0xff]  }
0x1fbc   :  { %2781 = vadd.xlane.f32.xlu1 %v2780_v58  ;;  %3764 = vmatpush3.bf16.msra.mxu1 %v3836_v44 }
0x1fbd   :  { %v2783_v61 = vsel %vm71_vm0, %v2775_v59, 0.0  ;;  %3765 = vmatprep.subr.bf16.mxu1 %v3968_v15 }
0x1fbe   :  { %2784 = vadd.xlane.f32.xlu0 %v2783_v61 }
0x1fc0   :  { %3766 = vmatpush3.bf16.msra.mxu1 %v3837_v9 }
0x1fc1   :  { %3791 = vmatprep.subr.bf16.mxu1 %v3968_v15 }
0x2049   :  { %v2782_v62 = vpop.xlane.xlu1 %2781 }
0x204a   :  { %v2786_v0 = vmul.f32 0.03125, %v2782_v62  ;;  %v3342_v62 = vld [vmem:[%s4782_s13 + $0x1] ss:$0 sm:$0xff] }
0x204b   :  { %v2785_v1 = vpop.xlane.xlu0 %2784 }
0x204c   :  { %v2788_v3 = vsub.f32 %v2774_v57, %v2786_v0  ;;  %v2787_v4 = vmul.f32 0.03125, %v2785_v1 }
0x204e   :  { %v2789_v5 = vsub.f32 %v2775_v59, %v2787_v4  ;;  %v2790_v6 = vmul.f32 %v2788_v3, %v2788_v3 }
0x2050   :  { %v2792_v7 = vsel %vm71_vm0, %v2790_v6, 0.0  ;;  %v2791_v8 = vmul.f32 %v2789_v5, %v2789_v5 }
0x2051   :  { %2793 = vadd.xlane.f32.xlu0 %v2792_v7 }
0x2052   :  { %v2795_v43 = vsel %vm71_vm0, %v2791_v8, 0.0 }
0x2053   :  { %2796 = vadd.xlane.f32.xlu1 %v2795_v43 }
0x20de   :  { %v2794_v12 = vpop.xlane.xlu0 %2793 }
0x20df   :  { %v2798_v13 = vmul.f32 0.03125, %v2794_v12 }
0x20e0   :  { %v2797_v32 = vpop.xlane.xlu1 %2796 }
0x20e1   :  { %v2800_v16 = vadd.f32 1e-12, %v2798_v13  ;;  %v2799_v63 = vmul.f32 0.03125, %v2797_v32 }
0x20e3   :  { %3930 = vrsqrt.f32 %v2800_v16  ;;  %v2801_v17 = vadd.f32 1e-12, %v2799_v63 }
0x20e5   :  { %3932 = vrsqrt.f32 %v2801_v17 }
0x20ed   :  { %v3931_v50 = vpop.eup %3930 }
0x20ee   :  { %v2804_v19 = vmul.f32 %v3931_v50, %v2788_v3 }
0x20ef   :  { %v3933_v20 = vpop.eup %3932 }
0x20f0   :  { %v2812_v21 = vmul.f32 %v3314_v18, %v2804_v19  ;;  %v2805_v22 = vmul.f32 %v3933_v20, %v2789_v5  ;;  %v3846_v20 = vld [vmem:[%s4785_s16] sm:$0xff]  }
0x20f2   :  { %v2813_v23 = vmul.f32 %v3314_v18, %v2805_v22  ;;  %v4674_v31 = vadd.f32 %v3315_v10, %v2812_v21  ;;  %v3847_v21 = vld [vmem:[%s4785_s16 + $0x8] sm:$0xff]  }
0x20f4   :  { %v4676_v2 = vadd.f32 %v3315_v10, %v2813_v23 }
0x20f6   :  { %v2822_v24 = vpack.c.bf16 %v4676_v2, %v4674_v31 }
0x20f8   :  { %3768 = vmatmul.mubr.msk.bf16.vlgmr.msra.gmra.mrb[96].mxu1 %vm71_vm0, %v2822_v24 }
0x20f9   :  { %3795 = vmatprep.mubr.msk.bf16.mxu1 %vm3969_vm1, %v3968_v15  ;;  %3792 = vmatpush3.bf16.msra.mxu1 %v3846_v20 }
0x20fa   :  { %3793 = vmatprep.subr.bf16.mxu1 %v3968_v15 }
0x20fd   :  { %3794 = vmatpush3.bf16.msra.mxu1 %v3847_v21 }
0x20fe   :  { %3799 = vmatprep.subr.bf16.mxu1 %v3968_v15 }
0x21cb   :  { %v2885_v42 = vpop.f32.mrb[96].mxu1 }
0x21cc   :  { %v2886_v30 = vadd.f32 %v3321_v52, %v2885_v42  ;;  %v3769_v33 = vpop.f32.mrb[97].mxu1 }
0x21cd   :  { %v2888_v34 = vpop.f32.mrb[98].mxu1 }
0x21ce   :  { %v2894_v35 = vmul.f32 0.044715, %v2886_v30  ;;  %v2889_v36 = vadd.f32 %v3321_v52, %v2888_v34  ;;  %v3770_v37 = vpop.f32.mrb[99].mxu1  ;;  %v2892_v54 = vmul.f32 0.5, %v2886_v30 }
0x21d0   :  { %v2896_v39 = vmul.f32 %v2894_v35, %v2886_v30  ;;  %v2895_v60 = vmul.f32 0.044715, %v2889_v36  ;;  %v2893_v56 = vmul.f32 0.5, %v2889_v36 }
0x21d2   :  { %v2898_v38 = vmul.f32 %v2896_v39, %v2886_v30  ;;  %v2897_v40 = vmul.f32 %v2895_v60, %v2889_v36  ;;  %v3848_v60 = vld [vmem:[%s4787_s18] sm:$0xff]  }
0x21d4   :  { %v2900_v41 = vadd.f32 %v2898_v38, %v2886_v30  ;;  %v2899_v45 = vmul.f32 %v2897_v40, %v2889_v36  ;;  %v3849_v38 = vld [vmem:[%s4787_s18 + $0x8] sm:$0xff]   ;;  %v3355_v40 = vld [vmem:[%s4786_s17] ss:$0 sm:$0xff]  ;;  %s3982_s18 = smov [#allocation2]  }
0x21d5   :  { %s3224_s1 = sshll.u32 %s3982_s18, 4  ;;  %s3225_s1 = int_to_ptr.vmem [resolvable:$true] %s3224_s1 }
0x21d6   :  { %v2902_v49 = vmul.f32 0.7978846, %v2900_v41  ;;  %v2901_v46 = vadd.f32 %v2899_v45, %v2889_v36  ;;  %s3944_s17 = scalar_lea.vmem %s3225_s1, 32  ;;  %p3949_p1 = scmp.lt.s32.totalorder %s3225_s1, %s3225_s1 }
0x21d7   :  { %p3945_p0 = scmp.ne.s32.totalorder %s3225_s1, %s3944_s17  ;;  %p3950_p2 = scmp.lt.s32.totalorder %s3944_s17, %s3944_s17 }
0x21d8   :  { %3934 = vtanh.f32 %v2902_v49  ;;  %v2903_v47 = vmul.f32 0.7978846, %v2901_v46 }
0x21d9   :  { %p3951_p3 = por %p3950_p2, %p3949_p1 }
0x21da   :  { %3936 = vtanh.f32 %v2903_v47 }
0x21db   :  { %p3952_p4 = pnand %p3951_p3, %p3945_p0 }
0x21e2   :  { %v3935_v48 = vpop.eup %3934 }
0x21e3   :  { %v2906_v51 = vadd.f32 1.0, %v3935_v48 }
0x21e4   :  { %v3937_v53 = vpop.eup %3936 }
0x21e5   :  { %v2907_v57 = vadd.f32 1.0, %v3937_v53  ;;  %v2908_v58 = vmul.f32 %v2906_v51, %v2892_v54 }
0x21e7   :  { %v2909_v59 = vmul.f32 %v2907_v57, %v2893_v56 }
0x21e9   :  { %v2910_v61 = vpack.c.bf16 %v2909_v59, %v2908_v58 }
0x21eb   :  { %3788 = vmatmul.mubr.bf16.vlgmr.msra.gmra.mrb[80].mxu0 %v2910_v61 }
0x22be   :  { %v3018_v0 = vpop.f32.mrb[80].mxu0 }
0x22bf   :  { %v3019_v1 = vadd.f32 %v3342_v62, %v3018_v0  ;;  %v3789_v3 = vpop.f32.mrb[81].mxu0 }
0x22c0   :  { %v3021_v4 = vpop.f32.mrb[82].mxu0 }
0x22c1   :  { %v3022_v5 = vadd.f32 %v3342_v62, %v3021_v4  ;;  %v3790_v6 = vpop.f32.mrb[83].mxu0  ;;  %v3025_v7 = vadd.f32 %v3019_v1, %v4674_v31 }
0x22c3   :  { %v3031_v8 = vsel %vm71_vm0, %v3025_v7, 0.0  ;;  %v3026_v43 = vadd.f32 %v3022_v5, %v4676_v2 }
0x22c4   :  { %3032 = vadd.xlane.f32.xlu1 %v3031_v8 }
0x22c5   :  { %v3034_v44 = vsel %vm71_vm0, %v3026_v43, 0.0 }
0x22c6   :  { %3035 = vadd.xlane.f32.xlu0 %v3034_v44 }
0x2351   :  { %v3033_v9 = vpop.xlane.xlu1 %3032 }
0x2352   :  { %v3037_v12 = vmul.f32 0.03125, %v3033_v9 }
0x2353   :  { %v3036_v13 = vpop.xlane.xlu0 %3035 }
0x2354   :  { %v3039_v32 = vsub.f32 %v3025_v7, %v3037_v12  ;;  %v3038_v16 = vmul.f32 0.03125, %v3036_v13 }
0x2356   :  { %v3040_v63 = vsub.f32 %v3026_v43, %v3038_v16  ;;  %v3041_v17 = vmul.f32 %v3039_v32, %v3039_v32 }
0x2358   :  { %v3043_v50 = vsel %vm71_vm0, %v3041_v17, 0.0  ;;  %v3042_v18 = vmul.f32 %v3040_v63, %v3040_v63 }
0x2359   :  { %3044 = vadd.xlane.f32.xlu1 %v3043_v50 }
0x235a   :  { %v3046_v19 = vsel %vm71_vm0, %v3042_v18, 0.0 }
0x235b   :  { %3047 = vadd.xlane.f32.xlu0 %v3046_v19 }
0x23e6   :  { %v3045_v22 = vpop.xlane.xlu1 %3044 }
0x23e7   :  { %v3049_v10 = vmul.f32 0.03125, %v3045_v22 }
0x23e8   :  { %v3048_v23 = vpop.xlane.xlu0 %3047 }
0x23e9   :  { %v3051_v31 = vadd.f32 1e-12, %v3049_v10  ;;  %v3050_v2 = vmul.f32 0.03125, %v3048_v23 }
0x23eb   :  { %3938 = vrsqrt.f32 %v3051_v31  ;;  %v3052_v24 = vadd.f32 1e-12, %v3050_v2 }
0x23ed   :  { %3940 = vrsqrt.f32 %v3052_v24 }
0x23f5   :  { %v3939_v11 = vpop.eup %3938 }
0x23f6   :  { %v3055_v25 = vmul.f32 %v3939_v11, %v3039_v32 }
0x23f7   :  { %v3941_v26 = vpop.eup %3940 }
0x23f8   :  { %v3063_v27 = vmul.f32 %v3353_v55, %v3055_v25  ;;  %v3056_v28 = vmul.f32 %v3941_v26, %v3040_v63 }
0x23fa   :  { %v3071_v29 = vadd.f32 %v3354_v14, %v3063_v27  ;;  %v3064_v52 = vmul.f32 %v3353_v55, %v3056_v28 }
0x23fc   :  { %v3072_v42 = vadd.f32 %v3354_v14, %v3064_v52  ;;  %v3073_v30 = vpack.c.bf16 %v3071_v29, %v3071_v29 }
0x23fe   :  { %v3074_v33 = vpack.c.bf16 %v3072_v42, %v3072_v42  ;;  %v3088_v35 = vunpack.c.l.b16 %v3073_v30 }
0x2400   :  { %v3089_v34 = vunpack.c.l.b16 %v3074_v33 }
0x2402   :  { %v3090_v36 = vrot.slane %v3089_v34, 7 }
0x2404   :  { %v3092_v37 = vsel %vm3091_vm4, %v3090_v36, %v3088_v35 }
0x2405   :  { %v3093_v39 = vpack.c.b16 %v3092_v37, %v3092_v37 }
0x2407   :  { %3796 = vmatmul.mubr.msk.bf16.vlgmr.msra.gmra.mrb[100].mxu1 %vm71_vm0, %v3093_v39 }
0x2408   :  { %3803 = vmatprep.mubr.msk.bf16.mxu1 %vm3969_vm1, %v3968_v15  ;;  %3800 = vmatpush3.bf16.msra.mxu1 %v3848_v60 }
0x2409   :  { %3801 = vmatprep.subr.bf16.mxu1 %v3968_v15  ;;  %v3359_v15 = vld [vmem:[%s4788_s19] ss:$0 sm:$0xff] }
0x240c   :  { %3802 = vmatpush3.bf16.msra.mxu1 %v3849_v38 }
0x24da   :  { %v3143_v41 = vpop.f32.mrb[100].mxu1 }
0x24db   :  { %v3144_v45 = vadd.f32 %v3355_v40, %v3143_v41  ;;  %v3797_v49 = vpop.f32.mrb[101].mxu1 }
0x24dc   :  { %v3146_v46 = vpop.f32.mrb[102].mxu1 }
0x24dd   :  { %3942 = vtanh.f32 %v3144_v45  ;;  %v3798_v47 = vpop.f32.mrb[103].mxu1 }
0x24e7   :  { %v3943_v48 = vpop.eup %3942 }
0x24e8   :  { %v3150_v51 = vpack.c.bf16 %v3943_v48, %v3943_v48 }
0x24ea   :  { %3804 = vmatmul.mubr.msk.bf16.vlgmr.msra.gmra.mrb[104].mxu1 %vm71_vm0, %v3150_v51 }
0x25bd   :  { %v3211_v53 = vpop.f32.mrb[104].mxu1 }
0x25be   :  { %v3212_v54 = vadd.f32 %v3359_v15, %v3211_v53  ;;  %v3805_v56 = vpop.f32.mrb[105].mxu1 }
0x25bf   :  { %v3214_v57 = vpop.f32.mrb[106].mxu1 }
0x25c0   :  { %3217 = vst [vmem:[#allocation2] sm:$0x3] %v3212_v54  ;;  %v3806_v58 = vpop.f32.mrb[107].mxu1 }
0x25c1   :  { %3955 = shalt.err (!%p3952_p4)
}
0x25c2   :  { %s3956_s19 = scalar_lea.hbm %s4789_s20, 32 }
0x25c3   :  { %p3957_p5 = scmp.ne.s32.totalorder %s4789_s20, %s3956_s19  ;;  %p3960_p6 = scmp.lt.u32.totalorder %s3956_s19, %s4789_s20 }
0x25c5   :  { %p3962_p7 = pnand %p3960_p6, %p3957_p5 }
0x25c7   :  { %3965 = shalt.err (!%p3962_p7)
}
0x25c8   :  { %3227 = dma.vmem_to_hbm [thread:$0]  %s3225_s1, 32, %s4789_s20, [#allocation3]  }
0x25c9   :  { %3966 = dma.done.wait [#allocation3], 32  }
0x25ca   :  { %3967 = vsyncadd [#allocation3], 4294967264 }
0x25cb   :  { %3231 = vsyncpa [#allocation3], 1 }

</bundles_post_ra>
